<compile_context>
chip_gen: v7x
topology: tpu7x:2x2x1
jax: 0.10.0
libtpu: 0.0.40
codegen_flags: <defaults>
</compile_context>

<pallas_src>
import numpy as np
import jax
import jax.numpy as jnp
from jax.experimental import pallas as pl
from jax.experimental.pallas import tpu as pltpu

_DT = 1e-3
_TWO_PI = float(2.0 * np.pi)
_INV_TWO_PI = float(1.0 / (2.0 * np.pi))
_N_OSC = 5


def _vmem_budget_bytes():
    """Generation-aware VMEM budget with headroom (v7x: 64 MiB physical)."""
    cap = 64 * 1024 * 1024  # conservative fallback (v7x physical VMEM)
    try:
        cap = int(pltpu.get_tpu_info().vmem_capacity_bytes)
    except Exception:
        pass
    return int(min(cap * 0.75, 100 * 1024 * 1024))


# --------------------------------------------------------------------------
# Kernel A: Kuramoto update + projection GEMV, tiled over the K axis.
#   phases_ref/amps_ref : (5, tk)     f32   (column slice k)
#   proj_ref            : (tk, H)     f32   (row slice k)
#   comp_ref            : (1, H)      f32   resident accumulator across k
#   new_phases_ref      : (5, tk)     f32   (column slice k, written once)
# --------------------------------------------------------------------------
def _osc_projection_kernel(freq_ref, coup_ref,            # SMEM (pre-scaled by dt)
                           phases_ref, amps_ref, proj_ref,  # VMEM inputs
                           comp_ref, new_phases_ref):       # outputs
    p = phases_ref[...]                                   # (5, tk)
    a = amps_ref[...]                                     # (5, tk)
    rows = [p[i:i + 1, :] for i in range(_N_OSC)]         # five (1, tk) slabs

    # sin(p_i - p_j) only for j > i; antisymmetry supplies j < i.
    sin_d = {}
    for i in range(_N_OSC):
        for j in range(i + 1, _N_OSC):
            sin_d[(i, j)] = jnp.sin(rows[i] - rows[j])

    osc_sum = None
    for i in range(_N_OSC):
        # phases[i] + dt*freq[i] + sum_j dt*coupling[i,j]*sin(p_i - p_j)
        acc = rows[i] + freq_ref[i]                        # scalar from SMEM
        for j in range(_N_OSC):
            if j == i:
                continue                                   # sin(0) = 0
            c = coup_ref[i * _N_OSC + j]                   # dt*coupling[i,j]
            s_ij = sin_d[(i, j)] if j > i else -sin_d[(j, i)]
            acc = acc + c * s_ij
        # positive-divisor remainder (== torch.remainder(x, 2*pi), ~1 ulp)
        acc = acc - _TWO_PI * jnp.floor(acc * _INV_TWO_PI)
        new_phases_ref[pl.ds(i, 1), :] = acc
        contrib = a[i:i + 1, :] * jnp.sin(acc)
        osc_sum = contrib if osc_sum is None else osc_sum + contrib

    # K-tiled GEMV: comp (1, H) accumulates across the k grid axis.
    @pl.when(pl.program_id(0) == 0)
    def _():
        comp_ref[...] = jnp.zeros_like(comp_ref)

    comp_ref[...] += jnp.dot(osc_sum, proj_ref[...],
                             preferred_element_type=jnp.float32)


# --------------------------------------------------------------------------
# Kernel B: mem-bound broadcast residual add; comp is a plain input, so the
# batch axis can be "parallel" (v7x megacore sharding) and the body is a
# single dtype-matched vadd stream (no per-tile casts).
# --------------------------------------------------------------------------
def _broadcast_add_kernel(x_ref, comp_ref, out_ref):
    out_ref[...] = x_ref[...] + comp_ref[...]


def neural_oscillator_forward(x, frequencies, phases, amplitudes,
                              coupling, projection):
    B, H = x.shape
    # Host-side pre-scaling by dt (constant-folded by XLA).
    freqs_dt = (_DT * frequencies).reshape(_N_OSC).astype(jnp.float32)
    coup_dt = (_DT * coupling).reshape(_N_OSC * _N_OSC).astype(jnp.float32)
    phases = phases.astype(jnp.float32)
    amplitudes = amplitudes.astype(jnp.float32)
    projection = projection.astype(jnp.float32)

    budget = _vmem_budget_bytes()
    smem = pl.BlockSpec(memory_space=pltpu.MemorySpace.SMEM)

    # ---- Kernel A: K tile sized from the VMEM budget ------------------
    if H % 128 == 0:
        # double-buffered (tk, H) projection block dominates VMEM usage
        tk_cap = max(128, ((int(budget * 0.6) // (2 * H * 4)) // 128) * 128)
        tk = min(H, tk_cap)
        while H % tk != 0:
            tk -= 128
    else:
        tk = H  # single full-H block (see lane-padding TODO above)
    nk = pl.cdiv(H, tk)

    comp, new_phases = pl.pallas_call(
        _osc_projection_kernel,
        out_shape=(jax.ShapeDtypeStruct((1, H), jnp.float32),
                   jax.ShapeDtypeStruct((_N_OSC, H), jnp.float32)),
        grid=(nk,),
        in_specs=[
            smem,                                                  # freqs_dt (5,)
            smem,                                                  # coup_dt (25,)
            pl.BlockSpec((_N_OSC, tk), lambda k: (0, k)),          # phases
            pl.BlockSpec((_N_OSC, tk), lambda k: (0, k)),          # amplitudes
            pl.BlockSpec((tk, H), lambda k: (k, 0)),               # projection
        ],
        out_specs=(
            pl.BlockSpec((1, H), lambda k: (0, 0)),                # comp (accum)
            pl.BlockSpec((_N_OSC, tk), lambda k: (0, k)),          # new phases
        ),
        compiler_params=pltpu.CompilerParams(
            dimension_semantics=("arbitrary",),    # k is a reduction axis
            vmem_limit_bytes=budget),
    )(freqs_dt, coup_dt, phases, amplitudes, projection)

    # ---- Kernel B: batch tile sized from the VMEM budget ---------------
    itemsize = int(jnp.dtype(x.dtype).itemsize)
    # per grid step: 2 buffers * (x tile + out tile)
    tb_cap = (int(budget * 0.7) // (4 * H * itemsize)) // 8 * 8
    tb_cap = int(min(max(tb_cap, 8), 1024))
    tb = B if B <= tb_cap else tb_cap
    nb = pl.cdiv(B, tb)

    comp_x = comp.astype(x.dtype)   # pre-cast once; per-tile body is a bare vadd

    out = pl.pallas_call(
        _broadcast_add_kernel,
        out_shape=jax.ShapeDtypeStruct((B, H), x.dtype),
        grid=(nb,),
        in_specs=[
            pl.BlockSpec((tb, H), lambda b: (b, 0)),               # x
            pl.BlockSpec((1, H), lambda b: (0, 0)),                # comp (tiny)
        ],
        out_specs=pl.BlockSpec((tb, H), lambda b: (b, 0)),
        compiler_params=pltpu.CompilerParams(
            dimension_semantics=("parallel",),     # independent tiles -> megacore
            vmem_limit_bytes=budget),
    )(x, comp_x)

    return out, new_phases


def _reference_forward(x, frequencies, phases, amplitudes, coupling, projection):
    """Pure-JAX reference mirroring the PyTorch forward (modulation=None)."""
    phase_diff = phases[:, None, :] - phases[None, :, :]
    coupling_term = jnp.einsum('ij,ijh->ih', coupling, jnp.sin(phase_diff))
    new_phases = phases + _DT * (frequencies[:, None] + coupling_term)
    new_phases = jnp.mod(new_phases, _TWO_PI)
    oscillations = amplitudes * jnp.sin(new_phases)
    comp = jnp.matmul(oscillations.sum(axis=0), projection)
    return x + comp, new_phases


if __name__ == "__main__":
    B, H = 2, 128

    key = jax.random.PRNGKey(0)
    k_x, k_ph, k_cp, k_pr = jax.random.split(key, 4)

    # Deterministic parameter init matching NeuralOscillator.__init__ shapes.
    frequencies = jnp.array([1.0, 5.0, 10.0, 20.0, 40.0], dtype=jnp.float32)
    phases = jax.random.uniform(k_ph, (_N_OSC, H), dtype=jnp.float32) * _TWO_PI
    amplitudes = jnp.ones((_N_OSC, H), dtype=jnp.float32) * 0.1
    coupling = jax.random.normal(k_cp, (_N_OSC, _N_OSC), dtype=jnp.float32) * 0.1
    projection = jax.random.normal(k_pr, (H, H), dtype=jnp.float32) * 0.1

    x = jax.random.normal(k_x, (B, H), dtype=jnp.float32)

    out, new_phases = neural_oscillator_forward(
        x, frequencies, phases, amplitudes, coupling, projection)
    out = jax.block_until_ready(out)
    new_phases = jax.block_until_ready(new_phases)

    ref_out, ref_phases = _reference_forward(
        x, frequencies, phases, amplitudes, coupling, projection)

    np.testing.assert_allclose(np.asarray(out), np.asarray(ref_out),
                               rtol=1e-5, atol=1e-5)
    np.testing.assert_allclose(np.asarray(new_phases), np.asarray(ref_phases),
                               rtol=1e-5, atol=1e-5)

    print("KERNEL_OK")
</pallas_src>

<mosaic_0001>
module attributes {stable_mosaic.version = 11 : i64} {
  func.func @_osc_projection_kernel(%arg0: i32, %arg1: memref<5xf32, #tpu.memory_space<smem>>, %arg2: memref<25xf32, #tpu.memory_space<smem>>, %arg3: memref<5x128xf32, #tpu.memory_space<vmem>>, %arg4: memref<5x128xf32, #tpu.memory_space<vmem>>, %arg5: memref<128x128xf32, #tpu.memory_space<vmem>>, %arg6: memref<1x128xf32, #tpu.memory_space<vmem>>, %arg7: memref<5x128xf32, #tpu.memory_space<vmem>>) attributes {dimension_semantics = [#tpu.dimension_semantics<arbitrary>], iteration_bounds = array<i64: 1>, scalar_prefetch = 0 : i64, scratch_operands = 0 : i64, tpu.core_type = #tpu.core_type<tc>, window_params = [{transform_indices = @transform_0, window_bounds = array<i64: 5>}, {transform_indices = @transform_1, window_bounds = array<i64: 25>}, {transform_indices = @transform_2, window_bounds = array<i64: 5, 128>}, {transform_indices = @transform_3, window_bounds = array<i64: 5, 128>}, {transform_indices = @transform_4, window_bounds = array<i64: 128, 128>}, {pipeline_mode = #tpu.pipeline_mode<synchronous>, transform_indices = @transform_5, window_bounds = array<i64: 1, 128>}, {transform_indices = @transform_6, window_bounds = array<i64: 5, 128>}]} {
    %c0 = arith.constant 0 : index
    %c0_0 = arith.constant 0 : index
    %0 = vector.load %arg3[%c0, %c0_0] : memref<5x128xf32, #tpu.memory_space<vmem>>, vector<5x128xf32>
    %c0_1 = arith.constant 0 : index
    %c0_2 = arith.constant 0 : index
    %1 = vector.load %arg4[%c0_1, %c0_2] : memref<5x128xf32, #tpu.memory_space<vmem>>, vector<5x128xf32>
    %2 = vector.extract_strided_slice %0 {offsets = [0, 0], sizes = [1, 128], strides = [1, 1]} : vector<5x128xf32> to vector<1x128xf32>
    %3 = vector.extract_strided_slice %0 {offsets = [1, 0], sizes = [1, 128], strides = [1, 1]} : vector<5x128xf32> to vector<1x128xf32>
    %4 = vector.extract_strided_slice %0 {offsets = [2, 0], sizes = [1, 128], strides = [1, 1]} : vector<5x128xf32> to vector<1x128xf32>
    %5 = vector.extract_strided_slice %0 {offsets = [3, 0], sizes = [1, 128], strides = [1, 1]} : vector<5x128xf32> to vector<1x128xf32>
    %6 = vector.extract_strided_slice %0 {offsets = [4, 0], sizes = [1, 128], strides = [1, 1]} : vector<5x128xf32> to vector<1x128xf32>
    %7 = arith.subf %2, %3 : vector<1x128xf32>
    %8 = math.sin %7 : vector<1x128xf32>
    %9 = arith.subf %2, %4 : vector<1x128xf32>
    %10 = math.sin %9 : vector<1x128xf32>
    %11 = arith.subf %2, %5 : vector<1x128xf32>
    %12 = math.sin %11 : vector<1x128xf32>
    %13 = arith.subf %2, %6 : vector<1x128xf32>
    %14 = math.sin %13 : vector<1x128xf32>
    %15 = arith.subf %3, %4 : vector<1x128xf32>
    %16 = math.sin %15 : vector<1x128xf32>
    %17 = arith.subf %3, %5 : vector<1x128xf32>
    %18 = math.sin %17 : vector<1x128xf32>
    %19 = arith.subf %3, %6 : vector<1x128xf32>
    %20 = math.sin %19 : vector<1x128xf32>
    %21 = arith.subf %4, %5 : vector<1x128xf32>
    %22 = math.sin %21 : vector<1x128xf32>
    %23 = arith.subf %4, %6 : vector<1x128xf32>
    %24 = math.sin %23 : vector<1x128xf32>
    %25 = arith.subf %5, %6 : vector<1x128xf32>
    %26 = math.sin %25 : vector<1x128xf32>
    %c0_3 = arith.constant 0 : index
    %27 = memref.load %arg1[%c0_3] : memref<5xf32, #tpu.memory_space<smem>>
    %28 = vector.broadcast %27 : f32 to vector<1x128xf32>
    %29 = arith.addf %2, %28 : vector<1x128xf32>
    %c1 = arith.constant 1 : index
    %30 = memref.load %arg2[%c1] : memref<25xf32, #tpu.memory_space<smem>>
    %31 = vector.broadcast %30 : f32 to vector<1x128xf32>
    %32 = arith.mulf %31, %8 : vector<1x128xf32>
    %33 = arith.addf %29, %32 : vector<1x128xf32>
    %c2 = arith.constant 2 : index
    %34 = memref.load %arg2[%c2] : memref<25xf32, #tpu.memory_space<smem>>
    %35 = vector.broadcast %34 : f32 to vector<1x128xf32>
    %36 = arith.mulf %35, %10 : vector<1x128xf32>
    %37 = arith.addf %33, %36 : vector<1x128xf32>
    %c3 = arith.constant 3 : index
    %38 = memref.load %arg2[%c3] : memref<25xf32, #tpu.memory_space<smem>>
    %39 = vector.broadcast %38 : f32 to vector<1x128xf32>
    %40 = arith.mulf %39, %12 : vector<1x128xf32>
    %41 = arith.addf %37, %40 : vector<1x128xf32>
    %c4 = arith.constant 4 : index
    %42 = memref.load %arg2[%c4] : memref<25xf32, #tpu.memory_space<smem>>
    %43 = vector.broadcast %42 : f32 to vector<1x128xf32>
    %44 = arith.mulf %43, %14 : vector<1x128xf32>
    %45 = arith.addf %41, %44 : vector<1x128xf32>
    %cst = arith.constant 0.159154937 : f32
    %46 = vector.broadcast %cst : f32 to vector<1x128xf32>
    %47 = arith.mulf %45, %46 : vector<1x128xf32>
    %48 = math.floor %47 : vector<1x128xf32>
    %cst_4 = arith.constant 6.28318548 : f32
    %49 = vector.broadcast %cst_4 : f32 to vector<1x128xf32>
    %50 = arith.mulf %49, %48 : vector<1x128xf32>
    %51 = arith.subf %45, %50 : vector<1x128xf32>
    %c0_5 = arith.constant 0 : index
    %c0_6 = arith.constant 0 : index
    %52 = vector.load %arg7[%c0_5, %c0_6] : memref<5x128xf32, #tpu.memory_space<vmem>>, vector<1x128xf32>
    tpu.vector_store %arg7[%c0_5, %c0_6], %51 {strides = array<i32>} : memref<5x128xf32, #tpu.memory_space<vmem>>, vector<1x128xf32>,
    %53 = vector.extract_strided_slice %1 {offsets = [0, 0], sizes = [1, 128], strides = [1, 1]} : vector<5x128xf32> to vector<1x128xf32>
    %54 = math.sin %51 : vector<1x128xf32>
    %55 = arith.mulf %53, %54 : vector<1x128xf32>
    %c1_7 = arith.constant 1 : index
    %56 = memref.load %arg1[%c1_7] : memref<5xf32, #tpu.memory_space<smem>>
    %57 = vector.broadcast %56 : f32 to vector<1x128xf32>
    %58 = arith.addf %3, %57 : vector<1x128xf32>
    %c5 = arith.constant 5 : index
    %59 = memref.load %arg2[%c5] : memref<25xf32, #tpu.memory_space<smem>>
    %cst_8 = arith.constant 0.000000e+00 : f32
    %60 = vector.broadcast %cst_8 : f32 to vector<1x128xf32>
    %61 = arith.subf %60, %8 : vector<1x128xf32>
    %62 = vector.broadcast %59 : f32 to vector<1x128xf32>
    %63 = arith.mulf %62, %61 : vector<1x128xf32>
    %64 = arith.addf %58, %63 : vector<1x128xf32>
    %c7 = arith.constant 7 : index
    %65 = memref.load %arg2[%c7] : memref<25xf32, #tpu.memory_space<smem>>
    %66 = vector.broadcast %65 : f32 to vector<1x128xf32>
    %67 = arith.mulf %66, %16 : vector<1x128xf32>
    %68 = arith.addf %64, %67 : vector<1x128xf32>
    %c8 = arith.constant 8 : index
    %69 = memref.load %arg2[%c8] : memref<25xf32, #tpu.memory_space<smem>>
    %70 = vector.broadcast %69 : f32 to vector<1x128xf32>
    %71 = arith.mulf %70, %18 : vector<1x128xf32>
    %72 = arith.addf %68, %71 : vector<1x128xf32>
    %c9 = arith.constant 9 : index
    %73 = memref.load %arg2[%c9] : memref<25xf32, #tpu.memory_space<smem>>
    %74 = vector.broadcast %73 : f32 to vector<1x128xf32>
    %75 = arith.mulf %74, %20 : vector<1x128xf32>
    %76 = arith.addf %72, %75 : vector<1x128xf32>
    %cst_9 = arith.constant 0.159154937 : f32
    %77 = vector.broadcast %cst_9 : f32 to vector<1x128xf32>
    %78 = arith.mulf %76, %77 : vector<1x128xf32>
    %79 = math.floor %78 : vector<1x128xf32>
    %cst_10 = arith.constant 6.28318548 : f32
    %80 = vector.broadcast %cst_10 : f32 to vector<1x128xf32>
    %81 = arith.mulf %80, %79 : vector<1x128xf32>
    %82 = arith.subf %76, %81 : vector<1x128xf32>
    %c1_11 = arith.constant 1 : index
    %c0_12 = arith.constant 0 : index
    %83 = vector.load %arg7[%c1_11, %c0_12] : memref<5x128xf32, #tpu.memory_space<vmem>>, vector<1x128xf32>
    tpu.vector_store %arg7[%c1_11, %c0_12], %82 {strides = array<i32>} : memref<5x128xf32, #tpu.memory_space<vmem>>, vector<1x128xf32>,
    %84 = vector.extract_strided_slice %1 {offsets = [1, 0], sizes = [1, 128], strides = [1, 1]} : vector<5x128xf32> to vector<1x128xf32>
    %85 = math.sin %82 : vector<1x128xf32>
    %86 = arith.mulf %84, %85 : vector<1x128xf32>
    %87 = arith.addf %55, %86 : vector<1x128xf32>
    %c2_13 = arith.constant 2 : index
    %88 = memref.load %arg1[%c2_13] : memref<5xf32, #tpu.memory_space<smem>>
    %89 = vector.broadcast %88 : f32 to vector<1x128xf32>
    %90 = arith.addf %4, %89 : vector<1x128xf32>
    %c10 = arith.constant 10 : index
    %91 = memref.load %arg2[%c10] : memref<25xf32, #tpu.memory_space<smem>>
    %cst_14 = arith.constant 0.000000e+00 : f32
    %92 = vector.broadcast %cst_14 : f32 to vector<1x128xf32>
    %93 = arith.subf %92, %10 : vector<1x128xf32>
    %94 = vector.broadcast %91 : f32 to vector<1x128xf32>
    %95 = arith.mulf %94, %93 : vector<1x128xf32>
    %96 = arith.addf %90, %95 : vector<1x128xf32>
    %c11 = arith.constant 11 : index
    %97 = memref.load %arg2[%c11] : memref<25xf32, #tpu.memory_space<smem>>
    %cst_15 = arith.constant 0.000000e+00 : f32
    %98 = vector.broadcast %cst_15 : f32 to vector<1x128xf32>
    %99 = arith.subf %98, %16 : vector<1x128xf32>
    %100 = vector.broadcast %97 : f32 to vector<1x128xf32>
    %101 = arith.mulf %100, %99 : vector<1x128xf32>
    %102 = arith.addf %96, %101 : vector<1x128xf32>
    %c13 = arith.constant 13 : index
    %103 = memref.load %arg2[%c13] : memref<25xf32, #tpu.memory_space<smem>>
    %104 = vector.broadcast %103 : f32 to vector<1x128xf32>
    %105 = arith.mulf %104, %22 : vector<1x128xf32>
    %106 = arith.addf %102, %105 : vector<1x128xf32>
    %c14 = arith.constant 14 : index
    %107 = memref.load %arg2[%c14] : memref<25xf32, #tpu.memory_space<smem>>
    %108 = vector.broadcast %107 : f32 to vector<1x128xf32>
    %109 = arith.mulf %108, %24 : vector<1x128xf32>
    %110 = arith.addf %106, %109 : vector<1x128xf32>
    %cst_16 = arith.constant 0.159154937 : f32
    %111 = vector.broadcast %cst_16 : f32 to vector<1x128xf32>
    %112 = arith.mulf %110, %111 : vector<1x128xf32>
    %113 = math.floor %112 : vector<1x128xf32>
    %cst_17 = arith.constant 6.28318548 : f32
    %114 = vector.broadcast %cst_17 : f32 to vector<1x128xf32>
    %115 = arith.mulf %114, %113 : vector<1x128xf32>
    %116 = arith.subf %110, %115 : vector<1x128xf32>
    %c2_18 = arith.constant 2 : index
    %c0_19 = arith.constant 0 : index
    %117 = vector.load %arg7[%c2_18, %c0_19] : memref<5x128xf32, #tpu.memory_space<vmem>>, vector<1x128xf32>
    tpu.vector_store %arg7[%c2_18, %c0_19], %116 {strides = array<i32>} : memref<5x128xf32, #tpu.memory_space<vmem>>, vector<1x128xf32>,
    %118 = vector.extract_strided_slice %1 {offsets = [2, 0], sizes = [1, 128], strides = [1, 1]} : vector<5x128xf32> to vector<1x128xf32>
    %119 = math.sin %116 : vector<1x128xf32>
    %120 = arith.mulf %118, %119 : vector<1x128xf32>
    %121 = arith.addf %87, %120 : vector<1x128xf32>
    %c3_20 = arith.constant 3 : index
    %122 = memref.load %arg1[%c3_20] : memref<5xf32, #tpu.memory_space<smem>>
    %123 = vector.broadcast %122 : f32 to vector<1x128xf32>
    %124 = arith.addf %5, %123 : vector<1x128xf32>
    %c15 = arith.constant 15 : index
    %125 = memref.load %arg2[%c15] : memref<25xf32, #tpu.memory_space<smem>>
    %cst_21 = arith.constant 0.000000e+00 : f32
    %126 = vector.broadcast %cst_21 : f32 to vector<1x128xf32>
    %127 = arith.subf %126, %12 : vector<1x128xf32>
    %128 = vector.broadcast %125 : f32 to vector<1x128xf32>
    %129 = arith.mulf %128, %127 : vector<1x128xf32>
    %130 = arith.addf %124, %129 : vector<1x128xf32>
    %c16 = arith.constant 16 : index
    %131 = memref.load %arg2[%c16] : memref<25xf32, #tpu.memory_space<smem>>
    %cst_22 = arith.constant 0.000000e+00 : f32
    %132 = vector.broadcast %cst_22 : f32 to vector<1x128xf32>
    %133 = arith.subf %132, %18 : vector<1x128xf32>
    %134 = vector.broadcast %131 : f32 to vector<1x128xf32>
    %135 = arith.mulf %134, %133 : vector<1x128xf32>
    %136 = arith.addf %130, %135 : vector<1x128xf32>
    %c17 = arith.constant 17 : index
    %137 = memref.load %arg2[%c17] : memref<25xf32, #tpu.memory_space<smem>>
    %cst_23 = arith.constant 0.000000e+00 : f32
    %138 = vector.broadcast %cst_23 : f32 to vector<1x128xf32>
    %139 = arith.subf %138, %22 : vector<1x128xf32>
    %140 = vector.broadcast %137 : f32 to vector<1x128xf32>
    %141 = arith.mulf %140, %139 : vector<1x128xf32>
    %142 = arith.addf %136, %141 : vector<1x128xf32>
    %c19 = arith.constant 19 : index
    %143 = memref.load %arg2[%c19] : memref<25xf32, #tpu.memory_space<smem>>
    %144 = vector.broadcast %143 : f32 to vector<1x128xf32>
    %145 = arith.mulf %144, %26 : vector<1x128xf32>
    %146 = arith.addf %142, %145 : vector<1x128xf32>
    %cst_24 = arith.constant 0.159154937 : f32
    %147 = vector.broadcast %cst_24 : f32 to vector<1x128xf32>
    %148 = arith.mulf %146, %147 : vector<1x128xf32>
    %149 = math.floor %148 : vector<1x128xf32>
    %cst_25 = arith.constant 6.28318548 : f32
    %150 = vector.broadcast %cst_25 : f32 to vector<1x128xf32>
    %151 = arith.mulf %150, %149 : vector<1x128xf32>
    %152 = arith.subf %146, %151 : vector<1x128xf32>
    %c3_26 = arith.constant 3 : index
    %c0_27 = arith.constant 0 : index
    %153 = vector.load %arg7[%c3_26, %c0_27] : memref<5x128xf32, #tpu.memory_space<vmem>>, vector<1x128xf32>
    tpu.vector_store %arg7[%c3_26, %c0_27], %152 {strides = array<i32>} : memref<5x128xf32, #tpu.memory_space<vmem>>, vector<1x128xf32>,
    %154 = vector.extract_strided_slice %1 {offsets = [3, 0], sizes = [1, 128], strides = [1, 1]} : vector<5x128xf32> to vector<1x128xf32>
    %155 = math.sin %152 : vector<1x128xf32>
    %156 = arith.mulf %154, %155 : vector<1x128xf32>
    %157 = arith.addf %121, %156 : vector<1x128xf32>
    %c4_28 = arith.constant 4 : index
    %158 = memref.load %arg1[%c4_28] : memref<5xf32, #tpu.memory_space<smem>>
    %159 = vector.broadcast %158 : f32 to vector<1x128xf32>
    %160 = arith.addf %6, %159 : vector<1x128xf32>
    %c20 = arith.constant 20 : index
    %161 = memref.load %arg2[%c20] : memref<25xf32, #tpu.memory_space<smem>>
    %cst_29 = arith.constant 0.000000e+00 : f32
    %162 = vector.broadcast %cst_29 : f32 to vector<1x128xf32>
    %163 = arith.subf %162, %14 : vector<1x128xf32>
    %164 = vector.broadcast %161 : f32 to vector<1x128xf32>
    %165 = arith.mulf %164, %163 : vector<1x128xf32>
    %166 = arith.addf %160, %165 : vector<1x128xf32>
    %c21 = arith.constant 21 : index
    %167 = memref.load %arg2[%c21] : memref<25xf32, #tpu.memory_space<smem>>
    %cst_30 = arith.constant 0.000000e+00 : f32
    %168 = vector.broadcast %cst_30 : f32 to vector<1x128xf32>
    %169 = arith.subf %168, %20 : vector<1x128xf32>
    %170 = vector.broadcast %167 : f32 to vector<1x128xf32>
    %171 = arith.mulf %170, %169 : vector<1x128xf32>
    %172 = arith.addf %166, %171 : vector<1x128xf32>
    %c22 = arith.constant 22 : index
    %173 = memref.load %arg2[%c22] : memref<25xf32, #tpu.memory_space<smem>>
    %cst_31 = arith.constant 0.000000e+00 : f32
    %174 = vector.broadcast %cst_31 : f32 to vector<1x128xf32>
    %175 = arith.subf %174, %24 : vector<1x128xf32>
    %176 = vector.broadcast %173 : f32 to vector<1x128xf32>
    %177 = arith.mulf %176, %175 : vector<1x128xf32>
    %178 = arith.addf %172, %177 : vector<1x128xf32>
    %c23 = arith.constant 23 : index
    %179 = memref.load %arg2[%c23] : memref<25xf32, #tpu.memory_space<smem>>
    %cst_32 = arith.constant 0.000000e+00 : f32
    %180 = vector.broadcast %cst_32 : f32 to vector<1x128xf32>
    %181 = arith.subf %180, %26 : vector<1x128xf32>
    %182 = vector.broadcast %179 : f32 to vector<1x128xf32>
    %183 = arith.mulf %182, %181 : vector<1x128xf32>
    %184 = arith.addf %178, %183 : vector<1x128xf32>
    %cst_33 = arith.constant 0.159154937 : f32
    %185 = vector.broadcast %cst_33 : f32 to vector<1x128xf32>
    %186 = arith.mulf %184, %185 : vector<1x128xf32>
    %187 = math.floor %186 : vector<1x128xf32>
    %cst_34 = arith.constant 6.28318548 : f32
    %188 = vector.broadcast %cst_34 : f32 to vector<1x128xf32>
    %189 = arith.mulf %188, %187 : vector<1x128xf32>
    %190 = arith.subf %184, %189 : vector<1x128xf32>
    %c4_35 = arith.constant 4 : index
    %c0_36 = arith.constant 0 : index
    %191 = vector.load %arg7[%c4_35, %c0_36] : memref<5x128xf32, #tpu.memory_space<vmem>>, vector<1x128xf32>
    tpu.vector_store %arg7[%c4_35, %c0_36], %190 {strides = array<i32>} : memref<5x128xf32, #tpu.memory_space<vmem>>, vector<1x128xf32>,
    %192 = vector.extract_strided_slice %1 {offsets = [4, 0], sizes = [1, 128], strides = [1, 1]} : vector<5x128xf32> to vector<1x128xf32>
    %193 = math.sin %190 : vector<1x128xf32>
    %194 = arith.mulf %192, %193 : vector<1x128xf32>
    %195 = arith.addf %157, %194 : vector<1x128xf32>
    %c0_i32 = arith.constant 0 : i32
    %196 = arith.cmpi eq, %arg0, %c0_i32 : i32
    %197 = arith.extui %196 : i1 to i32
    %c0_i32_37 = arith.constant 0 : i32
    %198 = arith.cmpi ne, %197, %c0_i32_37 : i32
    scf.if %198 {
      %cst_45 = arith.constant 0.000000e+00 : f32
      %204 = vector.broadcast %cst_45 : f32 to vector<1x128xf32>
      %c0_46 = arith.constant 0 : index
      %c0_47 = arith.constant 0 : index
      %205 = vector.load %arg6[%c0_46, %c0_47] : memref<1x128xf32, #tpu.memory_space<vmem>>, vector<1x128xf32>
      tpu.vector_store %arg6[%c0_46, %c0_47], %204 {strides = array<i32>} : memref<1x128xf32, #tpu.memory_space<vmem>>, vector<1x128xf32>,
    } else {
    }
    %c0_38 = arith.constant 0 : index
    %c0_39 = arith.constant 0 : index
    %199 = vector.load %arg6[%c0_38, %c0_39] : memref<1x128xf32, #tpu.memory_space<vmem>>, vector<1x128xf32>
    %c0_40 = arith.constant 0 : index
    %c0_41 = arith.constant 0 : index
    %200 = vector.load %arg5[%c0_40, %c0_41] : memref<128x128xf32, #tpu.memory_space<vmem>>, vector<128x128xf32>
    %cst_42 = arith.constant dense<0.000000e+00> : vector<1x128xf32>
    %201 = tpu.matmul %195, %200, %cst_42 {dimension_numbers = #tpu.dot_dimension_numbers<[1], [0], [0], [1], [0, 0, 1, 1], [], []>} : vector<1x128xf32>, vector<128x128xf32>, vector<1x128xf32> -> vector<1x128xf32>
    %202 = arith.addf %199, %201 : vector<1x128xf32>
    %c0_43 = arith.constant 0 : index
    %c0_44 = arith.constant 0 : index
    %203 = vector.load %arg6[%c0_43, %c0_44] : memref<1x128xf32, #tpu.memory_space<vmem>>, vector<1x128xf32>
    tpu.vector_store %arg6[%c0_43, %c0_44], %202 {strides = array<i32>} : memref<1x128xf32, #tpu.memory_space<vmem>>, vector<1x128xf32>,
    return
  }
  func.func @transform_0(%arg0: i32) -> i32 {
    %c0_i32 = arith.constant 0 : i32
    %c0_i32_0 = arith.constant 0 : i32
    return %c0_i32 : i32
  }
  func.func @transform_1(%arg0: i32) -> i32 {
    %c0_i32 = arith.constant 0 : i32
    %c0_i32_0 = arith.constant 0 : i32
    return %c0_i32 : i32
  }
  func.func @transform_2(%arg0: i32) -> (i32, i32) {
    %c0_i32 = arith.constant 0 : i32
    %c0_i32_0 = arith.constant 0 : i32
    return %c0_i32, %arg0 : i32, i32
  }
  func.func @transform_3(%arg0: i32) -> (i32, i32) {
    %c0_i32 = arith.constant 0 : i32
    %c0_i32_0 = arith.constant 0 : i32
    return %c0_i32, %arg0 : i32, i32
  }
  func.func @transform_4(%arg0: i32) -> (i32, i32) {
    %c0_i32 = arith.constant 0 : i32
    %c0_i32_0 = arith.constant 0 : i32
    return %arg0, %c0_i32 : i32, i32
  }
  func.func @transform_5(%arg0: i32) -> (i32, i32) {
    %c0_i32 = arith.constant 0 : i32
    %c0_i32_0 = arith.constant 0 : i32
    %c0_i32_1 = arith.constant 0 : i32
    return %c0_i32, %c0_i32_0 : i32, i32
  }
  func.func @transform_6(%arg0: i32) -> (i32, i32) {
    %c0_i32 = arith.constant 0 : i32
    %c0_i32_0 = arith.constant 0 : i32
    return %c0_i32, %arg0 : i32, i32
  }
}

</mosaic_0001>

<bundles_post_ra>
// kernel: tpu_custom_call.1
= control target key start
LH: loop header
LB: loop body
LE: loop exit
PB: predicated region body
PF: predicated region fallthrough
CT: control target
= control target key end

     0   :  { %12 = vsyncpa [#allocation5], 0  ;;  %s2759_s0 = inlined_call_operand.hbm [shape: f32[5], index: 0, kind: input, shape index: {}]   ;;  %s2760_s1 = inlined_call_operand.vmem [shape: f32[25], index: 1, kind: input, shape index: {}]   ;;  %s2761_s2 = inlined_call_operand.hbm [shape: f32[5,128], index: 2, kind: input, shape index: {}]   ;;  %s2762_s3 = inlined_call_operand.vmem [shape: f32[5,128], index: 3, kind: input, shape index: {}]   ;;  %s2763_s4 = inlined_call_operand.hbm [shape: f32[128,128], index: 4, kind: input, shape index: {}]   ;;  %s2764_s5 = inlined_call_operand.hbm [shape: f32[1,128], index: 5, kind: output, shape index: {0}]   ;;  %s2765_s6 = inlined_call_operand.hbm [shape: f32[5,128], index: 6, kind: output, shape index: {1}]  }
   0x1   :  { %13 = vsyncpa [#allocation6], 0 }
   0x2   :  { %14 = vsyncpa [#allocation3], 0 }
   0x3   :  { %15 = vsyncpa [#allocation10], 0 }
   0x4   :  { %16 = vsyncpa [#allocation4], 0 }
   0x5   :  { %17 = vsyncpa [#allocation13], 0  ;;  %s32_s23 = sshll.u32 %s2760_s1, 4  ;;  %s1551_s26 = scalar_lea.hbm %s2759_s0, 16  ;;  %s33_s23 = int_to_ptr.vmem [resolvable:$true] %s32_s23 }
   0x6   :  { %p1552_p0 = scmp.ne.s32.totalorder %s2759_s0, %s1551_s26  ;;  %p1555_p1 = scmp.lt.u32.totalorder %s1551_s26, %s2759_s0 }
   0x8   :  { %p1557_p2 = pnand %p1555_p1, %p1552_p0 }
   0xa   :  { %1560 = shalt.err (!%p1557_p2)
}
   0xb   :  { %s1673_s7 = smov [#allocation2]   ;;  %s1561_s1 = scalar_lea.vmem %s33_s23, 16 }
   0xc   :  { %25 = dma.hbm_to_smem %s2759_s0, 16, %s1673_s7, [#allocation5]  }
   0xd   :  { %p1562_p3 = scmp.ne.s32.totalorder %s33_s23, %s1561_s1  ;;  %p1566_p4 = scmp.lt.s32.totalorder %s33_s23, %s33_s23 }
   0xe   :  { %p1567_p5 = scmp.lt.s32.totalorder %s1561_s1, %s1561_s1 }
  0x10   :  { %p1568_p6 = por %p1567_p5, %p1566_p4 }
  0x12   :  { %p1569_p7 = pnand %p1568_p6, %p1562_p3 }
  0x14   :  { %1572 = shalt.err (!%p1569_p7)
}
  0x15   :  { %s1674_s10 = smov [#allocation7]   ;;  %s1675_s11 = smov [#allocation8]  }
  0x16   :  { %35 = dma.vmem_to_smem %s33_s23, 16, %s1674_s10, [#allocation6]  }
  0x17   :  { %s42_s12 = sshll.u32 %s1675_s11, 4  ;;  %s1676_s13 = smov [#allocation9]   ;;  %s43_s12 = int_to_ptr.vmem [resolvable:$true] %s42_s12 }
  0x18   :  { %s53_s14 = sshll.u32 %s1676_s13, 4  ;;  %s1573_s0 = scalar_lea.hbm %s2761_s2, 128  ;;  %s1740_s14 = int_to_ptr.vmem [resolvable:$true] %s53_s14 }
  0x19   :  { %p1574_p8 = scmp.ne.s32.totalorder %s2761_s2, %s1573_s0  ;;  %p1577_p9 = scmp.lt.u32.totalorder %s1573_s0, %s2761_s2 }
  0x1b   :  { %p1579_p10 = pnand %p1577_p9, %p1574_p8 }
  0x1d   :  { %1582 = shalt.err (!%p1579_p10)
}
  0x1e   :  { %s1583_s21 = scalar_lea.vmem %s43_s12, 128  ;;  %p1588_p12 = scmp.lt.s32.totalorder %s43_s12, %s43_s12 }
  0x1f   :  { %p1584_p11 = scmp.ne.s32.totalorder %s43_s12, %s1583_s21  ;;  %p1589_p13 = scmp.lt.s32.totalorder %s1583_s21, %s1583_s21 }
  0x21   :  { %p1590_p0 = por %p1589_p13, %p1588_p12 }
  0x23   :  { %p1591_p1 = pnand %p1590_p0, %p1584_p11 }
  0x25   :  { %1594 = shalt.err (!%p1591_p1)
}
  0x26   :  { %45 = dma.hbm_to_vmem [thread:$0]  %s2761_s2, 128, %s43_s12, [#allocation3]  }
  0x27   :  { %s1595_s26 = scalar_lea.hbm %s2763_s4, 2048 }
  0x28   :  { %p1596_p2 = scmp.ne.s32.totalorder %s2763_s4, %s1595_s26  ;;  %p1599_p3 = scmp.lt.u32.totalorder %s1595_s26, %s2763_s4 }
  0x2a   :  { %p1601_p4 = pnand %p1599_p3, %p1596_p2 }
  0x2c   :  { %1604 = shalt.err (!%p1601_p4)
}
  0x2d   :  { %s1605_s7 = scalar_lea.vmem %s1740_s14, 2048  ;;  %p1610_p6 = scmp.lt.s32.totalorder %s1740_s14, %s1740_s14 }
  0x2e   :  { %p1606_p5 = scmp.ne.s32.totalorder %s1740_s14, %s1605_s7  ;;  %p1611_p7 = scmp.lt.s32.totalorder %s1605_s7, %s1605_s7 }
  0x30   :  { %p1612_p8 = por %p1611_p7, %p1610_p6 }
  0x32   :  { %p1613_p9 = pnand %p1612_p8, %p1606_p5 }
  0x34   :  { %1616 = shalt.err (!%p1613_p9)
}
  0x35   :  { %s1677_s2 = smov 128   ;;  %s1678_s8 = smov 8  }
  0x36   :  { %59 = dma.hbm_to_vmem [thread:$0]  %s2763_s4, 2048, %s1740_s14, [#allocation10], %s1677_s2, %s1677_s2, %s1678_s8  }
  0x37   :  { %1661 = dma.done.wait [#allocation5], 16  }
  0x38   :  { %1662 = vsyncadd [#allocation5], 4294967280 }
  0x39   :  { %1663 = dma.done.wait [#allocation6], 16  }
  0x3a   :  { %1664 = vsyncadd [#allocation6], 4294967280 }
  0x3b   :  { %1665 = dma.done.wait [#allocation3], 128  }
  0x3c   :  { %1666 = vsyncadd [#allocation3], 4294967168 }
  0x3d   :  { %1667 = dma.done.wait [#allocation10], 2048  }
  0x3e   :  { %1668 = vsyncadd [#allocation10], 4294965248 }
  0x3f   :  { %72 = sfence }
  0x40   :  { %v1205_v0 = vld [vmem:[#allocation9] sm:$0xff]  ;;  %v1206_v1 = vld [vmem:[#allocation9 + $0x8] sm:$0xff]  ;;  %v1207_v2 = vld [vmem:[#allocation9 + $0x10] sm:$0xff]  ;;  %v1679_v3 = vmov 0.0|0.0   ;;  %v1680_v6 = vmov 0.0   ;;  %vm1681_vm0 = vmmov 0  }
  0x41   :  { %1437 = vmatprep.subr.bf16.mxu0 %v1679_v3  ;;  %v1438_v4 = vpack.c.bf16 %v1206_v1, %v1205_v0  ;;  %v1208_v5 = vld [vmem:[#allocation9 + $0x18] sm:$0xff]  ;;  %1203 = vst [vmem:[#allocation11] sm:$0x1] %v1680_v6  ;;  %1434 = vmatprep.mubr.msk.f32.mxu0 %vm1681_vm0, %v1680_v6  ;;  %v1209_v8 = vld [vmem:[#allocation9 + $0x20] sm:$0xff]  ;;  %v1210_v9 = vld [vmem:[#allocation9 + $0x28] sm:$0xff]  ;;  %s2091_s4 = sld [smem:[#allocation7 + $0x5]] }
  0x42   :  { %v1441_v7 = vpack.c.bf16 %v1208_v5, %v1207_v2  ;;  %v1773_v10 = vld [vmem:[#allocation8] sm:$0x1f]  ;;  %v1444_v12 = vpack.c.bf16 %v1210_v9, %v1209_v8  ;;  %v1211_v15 = vld [vmem:[#allocation9 + $0x30] sm:$0xff]  ;;  %v1213_v25 = vld [vmem:[#allocation9 + $0x40] sm:$0xff]  ;;  %v1682_v62 = vmov 683565275  }
  0x43   :  { %1439 = vmatpush3.bf16.msra.mxu0 %v1438_v4  ;;  %v76_v11 = vrot.slane %v1773_v10, 1  ;;  %v183_v13 = vrot.slane %v1773_v10, 2  ;;  %v290_v14 = vrot.slane %v1773_v10, 3  ;;  %v1212_v16 = vld [vmem:[#allocation9 + $0x38] sm:$0xff]  ;;  %v1214_v26 = vld [vmem:[#allocation9 + $0x48] sm:$0xff]  ;;  %v1215_v29 = vld [vmem:[#allocation9 + $0x50] sm:$0xff] }
  0x44   :  { %1440 = vmatprep.subr.bf16.mxu0 %v1679_v3  ;;  %v1447_v22 = vpack.c.bf16 %v1212_v16, %v1211_v15  ;;  %v1216_v30 = vld [vmem:[#allocation9 + $0x58] sm:$0xff]  ;;  %v1217_v34 = vld [vmem:[#allocation9 + $0x60] sm:$0xff]  ;;  %v1450_v36 = vpack.c.bf16 %v1214_v26, %v1213_v25  ;;  %v1218_v37 = vld [vmem:[#allocation9 + $0x68] sm:$0xff]  ;;  %v397_v52 = vrot.slane %v1773_v10, 4  ;;  %v1683_v0 = vmov 2475754826  }
  0x45   :  { %v1780_v17 = vsub.f32 %v1773_v10, %v76_v11  ;;  %v1783_v18 = vsub.f32 %v1773_v10, %v183_v13  ;;  %v1786_v19 = vsub.f32 %v1773_v10, %v290_v14  ;;  %v1798_v38 = vld [vmem:[#allocation9 + $0x70] sm:$0xff]  ;;  %v1800_v39 = vld [vmem:[#allocation9 + $0x78] sm:$0xff]  ;;  %v1453_v42 = vpack.c.bf16 %v1216_v30, %v1215_v29  ;;  %s2093_s10 = sld [smem:[#allocation2 + $0x2]]  ;;  %s2099_s12 = sld [smem:[#allocation7 + $0xb]] }
  0x46   :  { %v1456_v49 = vpack.c.bf16 %v1218_v37, %v1217_v34  ;;  %v1459_v50 = vpack.c.bf16 %v1800_v39, %v1798_v38  ;;  %v1684_v2 = vmov 2131351028   ;;  %v1685_v5 = vmov 2102212464   ;;  %s2095_s11 = sld [smem:[#allocation7 + $0xa]]  ;;  %s2108_s13 = sld [smem:[#allocation7 + $0xd]] }
  0x47   :  { %1442 = vmatpush3.bf16.msra.mxu0 %v1441_v7  ;;  %v79_v20 = vand.u32 2147483647, %v1780_v17  ;;  %v82_v21 = vand.u32 2139095040, %v1780_v17  ;;  %v186_v23 = vand.u32 2147483647, %v1783_v18  ;;  %v189_v24 = vand.u32 2139095040, %v1783_v18 }
  0x48   :  { %1443 = vmatprep.subr.bf16.mxu0 %v1679_v3  ;;  %v296_v33 = vand.u32 2139095040, %v1786_v19  ;;  %v293_v47 = vand.u32 2147483647, %v1786_v19  ;;  %v1686_v7 = vmov 920167782   ;;  %vm81_vm14 = vcmp.lt.s32.totalorder %v1780_v17, 0 }
  0x49   :  { %v83_v27 = vshrl.u32 %v82_v21, 23  ;;  %v86_v28 = vand.u32 8388607, %v79_v20  ;;  %v190_v31 = vshrl.u32 %v189_v24, 23  ;;  %v193_v32 = vand.u32 8388607, %v186_v23 }
  0x4a   :  { %v297_v41 = vshrl.u32 %v296_v33, 23  ;;  %v1816_v59 = vand.u32 8388607, %v293_v47  ;;  %v1687_v16 = vmov 1326507024   ;;  %s2110_s14 = sld [smem:[#allocation2 + $0x1]] }
  0x4b   :  { %1445 = vmatpush3.bf16.msra.mxu0 %v1444_v12  ;;  %v1325_v35 = vadd.s32 4294967169, %v83_v27  ;;  %v1329_v40 = vadd.s32 4294967169, %v190_v31  ;;  %v87_v43 = vor.u32 8388608, %v86_v28  ;;  %v194_v45 = vor.u32 8388608, %v193_v32  ;;  %s2118_s15 = sld [smem:[#allocation7 + $0xe]]  ;;  %s2127_s16 = sld [smem:[#allocation7 + $0x7]] }
  0x4c   :  { %1446 = vmatprep.subr.bf16.mxu0 %v1679_v3  ;;  %v1333_v48 = vadd.s32 4294967169, %v297_v41  ;;  %vm1938_vm0 = vcmp.le.f32.partialorder %v79_v20, 0.7853982  ;;  %s2146_s0 = sld [smem:[#allocation7 + $0x8]]  ;;  %s2165_s17 = sld [smem:[#allocation7 + $0x9]] }
  0x4d   :  { %v89_v44 = vadd.s32 1, %v1325_v35  ;;  %v196_v46 = vadd.s32 1, %v1329_v40  ;;  %v1808_v55 = vshll.u32 %v87_v43, 8  ;;  %v1812_v58 = vshll.u32 %v194_v45, 8  ;;  %s2168_s18 = sld [smem:[#allocation2]]  ;;  %s2171_s19 = sld [smem:[#allocation7 + $0x1]] }
  0x4e   :  { %v1818_v60 = vadd.s32 1, %v1333_v48  ;;  %s2176_s20 = sld [smem:[#allocation7 + $0xf]]  ;;  %s2183_s21 = sld [smem:[#allocation7 + $0x2]] }
  0x4f   :  { %1448 = vmatpush3.bf16.msra.mxu0 %v1447_v22  ;;  %vm90_vm1 = vcmp.gt.s32.totalorder %v89_v44, 0  ;;  %vm197_vm2 = vcmp.gt.s32.totalorder %v196_v46, 0  ;;  %s2187_s22 = sld [smem:[#allocation2 + $0x3]]  ;;  %s2193_s23 = sld [smem:[#allocation7 + $0x10]] }
  0x50   :  { %1449 = vmatprep.subr.bf16.mxu0 %v1679_v3  ;;  %v91_v51 = vsel %vm90_vm1, %v89_v44, 0  ;;  %v198_v56 = vsel %vm197_vm2, %v196_v46, 0  ;;  %vm304_vm7 = vcmp.gt.s32.totalorder %v1818_v60, 0  ;;  %s2207_s24 = sld [smem:[#allocation7 + $0x3]]  ;;  %s2212_s25 = sld [smem:[#allocation7 + $0x11]] }
  0x51   :  { %v92_v53 = vshrl.u32 %v91_v51, 5  ;;  %v93_v54 = vand.u32 31, %v91_v51  ;;  %v1810_v57 = vand.u32 31, %v198_v56  ;;  %v1825_v9 = vshrl.u32 %v198_v56, 5  ;;  %s2218_s26 = sld [smem:[#allocation7 + $0x4]]  ;;  %s2222_s27 = sld [smem:[#allocation7 + $0x13]] }
  0x52   :  { %s2226_s28 = sld [smem:[#allocation2 + $0x4]]  ;;  %s2330_s30 = sld [smem:[#allocation7 + $0x15]] }
  0x53   :  { %1451 = vmatpush3.bf16.msra.mxu0 %v1450_v36  ;;  %v94_v61 = vsub.s32 32, %v93_v54  ;;  %v96_v63 = vshll.u32 %v1682_v62, %v93_v54  ;;  %v99_v1 = vshll.u32 %v1683_v0, %v93_v54  ;;  %v102_v4 = vshll.u32 %v1684_v2, %v93_v54  ;;  %s2286_s29 = sld [smem:[#allocation7 + $0x14]]  ;;  %s2423_s7 = sld [smem:[#allocation7 + $0x16]] }
  0x54   :  { %1452 = vmatprep.subr.bf16.mxu0 %v1679_v3  ;;  %v105_v6 = vshll.u32 %v1685_v5, %v93_v54  ;;  %v108_v8 = vshll.u32 %v1686_v7, %v93_v54  ;;  %vm111_vm3 = vcmp.lt.s32.totalorder %v92_v53, 1  ;;  %vm112_vm4 = vcmp.lt.s32.totalorder %v92_v53, 2  ;;  %s2446_s2 = sld [smem:[#allocation7 + $0x17]] }
  0x55   :  { %v95_v11 = vshrl.u32 %v1682_v62, %v94_v61  ;;  %v97_v12 = vshrl.u32 %v1683_v0, %v94_v61  ;;  %v100_v13 = vshrl.u32 %v1684_v2, %v94_v61  ;;  %v103_v14 = vshrl.u32 %v1685_v5, %v94_v61 }
  0x56   :  { %v106_v15 = vshrl.u32 %v1686_v7, %v94_v61  ;;  %v109_v21 = vshrl.u32 %v1687_v16, %v94_v61  ;;  %vm114_vm5 = vcmp.lt.s32.totalorder %v92_v53, 4  ;;  %v201_v26 = vsub.s32 32, %v1810_v57 }
  0x57   :  { %1454 = vmatpush3.bf16.msra.mxu0 %v1453_v42  ;;  %v98_v22 = vor.u32 %v97_v12, %v96_v63  ;;  %v101_v24 = vor.u32 %v100_v13, %v99_v1  ;;  %v104_v25 = vor.u32 %v103_v14, %v102_v4  ;;  %vm113_vm6 = vcmp.lt.s32.totalorder %v92_v53, 3 }
  0x58   :  { %1455 = vmatprep.subr.bf16.mxu0 %v1679_v3  ;;  %v107_v27 = vor.u32 %v106_v15, %v105_v6  ;;  %v110_v28 = vor.u32 %v109_v21, %v108_v8  ;;  %v203_v29 = vshll.u32 %v1682_v62, %v1810_v57  ;;  %v206_v37 = vshll.u32 %v1683_v0, %v1810_v57 }
  0x59   :  { %v115_v30 = vsel %vm111_vm3, %v95_v11, %v98_v22  ;;  %v116_v31 = vsel %vm114_vm5, %v104_v25, 2102212464  ;;  %v119_v32 = vsel %vm111_vm3, %v98_v22, %v101_v24  ;;  %v123_v33 = vsel %vm111_vm3, %v101_v24, %v104_v25 }
  0x5a   :  { %v117_v34 = vsel %vm113_vm6, %v101_v24, %v116_v31  ;;  %v120_v35 = vsel %vm114_vm5, %v107_v27, 920167782  ;;  %v124_v36 = vsel %vm114_vm5, %v110_v28, 1326507024  ;;  %v202_v39 = vshrl.u32 %v1682_v62, %v201_v26 }
  0x5b   :  { %1457 = vmatpush3.bf16.msra.mxu0 %v1456_v49  ;;  %v121_v38 = vsel %vm113_vm6, %v104_v25, %v120_v35  ;;  %v204_v40 = vshrl.u32 %v1683_v0, %v201_v26  ;;  %v118_v41 = vsel %vm112_vm4, %v115_v30, %v117_v34  ;;  %v207_v44 = vshrl.u32 %v1684_v2, %v201_v26 }
  0x5c   :  { %1458 = vmatprep.subr.bf16.mxu0 %v1679_v3  ;;  %v125_v3 = vsel %vm113_vm6, %v107_v27, %v124_v36  ;;  %v122_v42 = vsel %vm112_vm4, %v119_v32, %v121_v38  ;;  %v210_v56 = vshrl.u32 %v1685_v5, %v201_v26  ;;  %v212_v53 = vshll.u32 %v1685_v5, %v1810_v57 }
  0x5d   :  { %v126_v43 = vsel %vm112_vm4, %v123_v33, %v125_v3  ;;  %v1858_v48 = vmul.u32.u64.low %v1808_v55, %v122_v42  ;;  %v1859_v49 = vmul.u32.u64.high %v1808_v55, %v122_v42, %v1858_v48  ;;  %v205_v51 = vor.u32 %v204_v40, %v203_v29 }
  0x5e   :  { %v1854_v45 = vmul.u32.u64.low %v1808_v55, %v126_v43  ;;  %v1855_v46 = vmul.u32.u64.high %v1808_v55, %v126_v43, %v1854_v45  ;;  %v208_v54 = vor.u32 %v207_v44, %v206_v37  ;;  %v213_v61 = vshrl.u32 %v1686_v7, %v201_v26 }
  0x5f   :  { %1460 = vmatpush3.bf16.msra.mxu0 %v1459_v50  ;;  %v209_v50 = vshll.u32 %v1684_v2, %v1810_v57  ;;  %v215_v63 = vshll.u32 %v1686_v7, %v1810_v57  ;;  %v216_v1 = vshrl.u32 %v1687_v16, %v201_v26  ;;  %v134_v4 = vmul.u32 %v1808_v55, %v118_v41 }
  0x60   :  { %vm218_vm8 = vcmp.lt.s32.totalorder %v1825_v9, 1  ;;  %vm219_vm9 = vcmp.lt.s32.totalorder %v1825_v9, 2  ;;  %vm136_vm10 = vc.u32 %v1855_v46, %v1858_v48  ;;  %v137_v8 = vadd.s32 1, %v1859_v49 }
  0x61   :  { %v211_v6 = vor.u32 %v210_v56, %v209_v50  ;;  %v214_v11 = vor.u32 %v213_v61, %v212_v53  ;;  %vm220_vm11 = vcmp.lt.s32.totalorder %v1825_v9, 3  ;;  %v217_v12 = vor.u32 %v216_v1, %v215_v63 }
  0x62   :  { %vm221_vm12 = vcmp.lt.s32.totalorder %v1825_v9, 4  ;;  %v222_v57 = vsel %vm218_vm8, %v202_v39, %v205_v51  ;;  %v226_v13 = vsel %vm218_vm8, %v205_v51, %v208_v54  ;;  %v138_v55 = vsel %vm136_vm10, %v137_v8, %v1859_v49 }
  0x63   :  { %v223_v14 = vsel %vm221_vm12, %v211_v6, 2102212464  ;;  %v227_v15 = vsel %vm221_vm12, %v214_v11, 920167782  ;;  %v230_v21 = vsel %vm218_vm8, %v208_v54, %v211_v6  ;;  %v139_v22 = vadd.s32 %v138_v55, %v134_v4 }
  0x64   :  { %v224_v24 = vsel %vm220_vm11, %v208_v54, %v223_v14  ;;  %v228_v25 = vsel %vm220_vm11, %v211_v6, %v227_v15  ;;  %v231_v26 = vsel %vm221_vm12, %v217_v12, 1326507024  ;;  %v305_v30 = vsel %vm304_vm7, %v1818_v60, 0 }
  0x65   :  { %v225_v27 = vsel %vm219_vm9, %v222_v57, %v224_v24  ;;  %v229_v28 = vsel %vm219_vm9, %v226_v13, %v228_v25  ;;  %v232_v29 = vsel %vm220_vm11, %v214_v11, %v231_v26  ;;  %v140_v31 = vadd.s32 536870912, %v139_v22 }
  0x66   :  { %v233_v32 = vsel %vm219_vm9, %v230_v21, %v232_v29  ;;  %v1890_v33 = vmul.u32.u64.low %v1812_v58, %v229_v28  ;;  %v1891_v34 = vmul.u32.u64.high %v1812_v58, %v229_v28, %v1890_v33  ;;  %v1901_v37 = vsub.f32 %v1773_v10, %v397_v52 }
  0x67   :  { %v1895_v35 = vmul.u32.u64.low %v1812_v58, %v233_v32  ;;  %v1896_v36 = vmul.u32.u64.high %v1812_v58, %v233_v32, %v1895_v35  ;;  %v141_v38 = vshrl.u32 %v140_v31, 30  ;;  %v301_v60 = vor.u32 8388608, %v1816_v59 }
  0x68   :  { %v307_v3 = vand.u32 31, %v305_v30  ;;  %v241_v9 = vmul.u32 %v1812_v58, %v225_v27  ;;  %v244_v40 = vadd.s32 1, %v1891_v34  ;;  %v400_v42 = vand.u32 2147483647, %v1901_v37 }
  0x69   :  { %v142_v39 = vshll.u32 %v141_v38, 30  ;;  %vm243_vm13 = vc.u32 %v1896_v36, %v1890_v33  ;;  %v403_v43 = vand.u32 2139095040, %v1901_v37  ;;  %v1914_v44 = vshrl.u32 %v305_v30, 5 }
  0x6a   :  { %v308_v41 = vsub.s32 32, %v307_v3  ;;  %v245_v59 = vsel %vm243_vm13, %v244_v40, %v1891_v34  ;;  %v1916_v58 = vshll.u32 %v301_v60, 8  ;;  %v310_v49 = vshll.u32 %v1682_v62, %v307_v3 }
  0x6b   :  { %v1911_v52 = vsub.s32 %v139_v22, %v142_v39  ;;  %v246_v45 = vadd.s32 %v245_v59, %v241_v9  ;;  %v313_v54 = vshll.u32 %v1683_v0, %v307_v3  ;;  %v316_v53 = vshll.u32 %v1684_v2, %v307_v3 }
  0x6c   :  { %v311_v51 = vshrl.u32 %v1683_v0, %v308_v41  ;;  %v314_v56 = vshrl.u32 %v1684_v2, %v308_v41  ;;  %v317_v61 = vshrl.u32 %v1685_v5, %v308_v41  ;;  %v135_v63 = vadd.s32 %v1858_v48, %v1855_v46 }
  0x6d   :  { %v145_v50 = vsub.s32 0, %v1911_v52  ;;  %v247_v1 = vadd.s32 536870912, %v246_v45  ;;  %v319_v4 = vshll.u32 %v1685_v5, %v307_v3  ;;  %v404_v6 = vshrl.u32 %v403_v43, 23 }
  0x6e   :  { %v165_v11 = vsub.s32 4, %v141_v38  ;;  %v320_v12 = vshrl.u32 %v1686_v7, %v308_v41  ;;  %vm328_vm15 = vcmp.lt.s32.totalorder %v1914_v44, 4  ;;  %v309_v13 = vshrl.u32 %v1682_v62, %v308_v41 }
  0x6f   :  { %v1326_v8 = vmin.u32 %v145_v50, %v1911_v52  ;;  %v1931_v57 = vshrl.u32 %v247_v1, 30  ;;  %v322_v55 = vshll.u32 %v1686_v7, %v307_v3  ;;  %v323_v14 = vshrl.u32 %v1687_v16, %v308_v41 }
  0x70   :  { %v312_v15 = vor.u32 %v311_v51, %v310_v49  ;;  %v315_v21 = vor.u32 %v314_v56, %v313_v54  ;;  %v318_v22 = vor.u32 %v317_v61, %v316_v53  ;;  %v321_v25 = vor.u32 %v320_v12, %v319_v4 }
  0x71   :  { %v147_v48 = vclz %v1326_v8  ;;  %v249_v24 = vshll.u32 %v1931_v57, 30  ;;  %vm325_vm1 = vcmp.lt.s32.totalorder %v1914_v44, 1  ;;  %vm327_vm2 = vcmp.lt.s32.totalorder %v1914_v44, 3 }
  0x72   :  { %v324_v27 = vor.u32 %v323_v14, %v322_v55  ;;  %v330_v28 = vsel %vm328_vm15, %v318_v22, 2102212464  ;;  %v1337_v20 = vadd.s32 4294967169, %v404_v6  ;;  %v166_v29 = vsel %vm81_vm14, %v165_v11, %v141_v38 }
  0x73   :  { %v1327_v26 = vadd.s32 4294967294, %v147_v48  ;;  %v1949_v30 = vsub.s32 %v246_v45, %v249_v24  ;;  %vm326_vm3 = vcmp.lt.s32.totalorder %v1914_v44, 2  ;;  %v334_v31 = vsel %vm328_vm15, %v321_v25, 920167782 }
  0x74   :  { %v329_v32 = vsel %vm325_vm1, %v309_v13, %v312_v15  ;;  %v333_v34 = vsel %vm325_vm1, %v312_v15, %v315_v21  ;;  %v335_v35 = vsel %vm327_vm2, %v318_v22, %v334_v31  ;;  %v331_v3 = vsel %vm327_vm2, %v315_v21, %v330_v28 }
  0x75   :  { %vm1328_vm4 = vcmp.lt.s32.totalorder %v1327_v26, 0  ;;  %v252_v38 = vsub.s32 0, %v1949_v30  ;;  %v337_v9 = vsel %vm325_vm1, %v315_v21, %v318_v22  ;;  %v338_v43 = vsel %vm328_vm15, %v324_v27, 1326507024 }
  0x76   :  { %v150_v60 = vsel %vm1328_vm4, 0, %v1327_v26  ;;  %v336_v45 = vsel %vm326_vm3, %v333_v34, %v335_v35  ;;  %v339_v49 = vsel %vm327_vm2, %v321_v25, %v338_v43  ;;  %v1975_v51 = vand.u32 8388607, %v400_v42 }
  0x77   :  { %v151_v39 = vsub.s32 32, %v150_v60  ;;  %v152_v40 = vshll.u32 %v1911_v52, %v150_v60  ;;  %v155_v41 = vsub.s32 4294967266, %v150_v60  ;;  %v1330_v59 = vmin.u32 %v252_v38, %v1949_v30 }
  0x78   :  { %v340_v52 = vsel %vm326_vm3, %v337_v9, %v339_v49  ;;  %v410_v56 = vadd.s32 1, %v1337_v20  ;;  %v168_v53 = vsel %vm1938_vm0, 0, %v166_v29  ;;  %v332_v1 = vsel %vm326_vm3, %v329_v32, %v331_v3 }
  0x79   :  { %v153_v54 = vshrl.u32 %v135_v63, %v151_v39  ;;  %v156_v50 = vadd.s32 127, %v155_v41  ;;  %v254_v61 = vclz %v1330_v59  ;;  %v408_v48 = vor.u32 8388608, %v1975_v51 }
  0x7a   :  { %v1984_v8 = vmul.u32.u64.low %v1916_v58, %v340_v52  ;;  %v1985_v11 = vmul.u32.u64.high %v1916_v58, %v340_v52, %v1984_v8  ;;  %v1988_v63 = vmul.u32.u64.low %v1916_v58, %v336_v45  ;;  %v1989_v13 = vmul.u32.u64.high %v1916_v58, %v336_v45, %v1988_v63 }
  0x7b   :  { %v154_v4 = vor.u32 %v153_v54, %v152_v40  ;;  %v157_v6 = vshll.u32 %v156_v50, 23  ;;  %v1331_v12 = vadd.s32 4294967294, %v254_v61  ;;  %vm411_vm5 = vcmp.gt.s32.totalorder %v410_v56, 0 }
  0x7c   :  { %v412_v15 = vsel %vm411_vm5, %v410_v56, 0  ;;  %v1993_v44 = vadd.s32 3, %v168_v53  ;;  %v242_v21 = vadd.s32 %v1890_v33, %v1896_v36  ;;  %v348_v26 = vmul.u32 %v1916_v58, %v332_v1 }
  0x7d   :  { %v158_v55 = vor.u32 4788187, %v157_v6  ;;  %v161_v14 = vcvt.s32.f32 %v154_v4  ;;  %vm1332_vm6 = vcmp.lt.s32.totalorder %v1331_v12, 0  ;;  %v414_v22 = vand.u32 31, %v412_v15 }
  0x7e   :  { %v257_v25 = vsel %vm1332_vm6, 0, %v1331_v12  ;;  %vm350_vm7 = vc.u32 %v1985_v11, %v1988_v63  ;;  %vm188_vm8 = vcmp.lt.s32.totalorder %v1783_v18, 0  ;;  %v351_v29 = vadd.s32 1, %v1989_v13 }
  0x7f   :  { %v159_v24 = vand.u32 2147483647, %v158_v55  ;;  %v258_v27 = vsub.s32 32, %v257_v25  ;;  %v259_v28 = vshll.u32 %v1949_v30, %v257_v25  ;;  %v262_v20 = vsub.s32 4294967266, %v257_v25 }
  0x80   :  { %v272_v33 = vsub.s32 4, %v1931_v57  ;;  %v2004_v36 = vshrl.u32 %v412_v15, 5  ;;  %v415_v32 = vsub.s32 32, %v414_v22  ;;  %v352_v58 = vsel %vm350_vm7, %v351_v29, %v1989_v13 }
  0x81   :  { %v162_v31 = vmul.f32 %v161_v14, %v159_v24  ;;  %v260_v34 = vshrl.u32 %v242_v21, %v258_v27  ;;  %v263_v35 = vadd.s32 127, %v262_v20  ;;  %v417_v60 = vshll.u32 %v1682_v62, %v414_v22 }
  0x82   :  { %v353_v3 = vadd.s32 %v352_v58, %v348_v26  ;;  %v418_v9 = vshrl.u32 %v1683_v0, %v415_v32  ;;  %v420_v30 = vshll.u32 %v1683_v0, %v414_v22  ;;  %vm2012_vm9 = vcmp.le.f32.partialorder %v186_v23, 0.7853982 }
  0x83   :  { %v163_v38 = vxor.u32 2147483648, %v162_v31  ;;  %v261_v40 = vor.u32 %v260_v34, %v259_v28  ;;  %v264_v41 = vshll.u32 %v263_v35, 23  ;;  %v421_v43 = vshrl.u32 %v1684_v2, %v415_v32 }
  0x84   :  { %v423_v59 = vshll.u32 %v1684_v2, %v414_v22  ;;  %v354_v49 = vadd.s32 536870912, %v353_v3  ;;  %v424_v51 = vshrl.u32 %v1685_v5, %v415_v32  ;;  %v426_v54 = vshll.u32 %v1685_v5, %v414_v22 }
  0x85   :  { %v164_v45 = vsel %vm81_vm14, %v163_v38, %v162_v31  ;;  %v265_v50 = vor.u32 4788187, %v264_v41  ;;  %v268_v52 = vcvt.s32.f32 %v261_v40  ;;  %v419_v56 = vor.u32 %v418_v9, %v417_v60 }
  0x86   :  { %v167_v23 = vsel %vm1938_vm0, %v1780_v17, %v164_v45  ;;  %v2025_v53 = vshrl.u32 %v354_v49, 30  ;;  %v422_v61 = vor.u32 %v421_v43, %v420_v30  ;;  %v427_v1 = vshrl.u32 %v1686_v7, %v415_v32 }
  0x87   :  { %1514 = vcosq.f32 %v167_v23  ;;  %v266_v4 = vand.u32 2147483647, %v265_v50  ;;  %v429_v6 = vshll.u32 %v1686_v7, %v414_v22  ;;  %v430_v8 = vshrl.u32 %v1687_v16, %v415_v32 }
  0x88   :  { %1516 = vsinq.f32 %v167_v23  ;;  %v273_v46 = vsel %vm188_vm8, %v272_v33, %v1931_v57  ;;  %v356_v12 = vshll.u32 %v2025_v53, 30  ;;  %v428_v13 = vor.u32 %v427_v1, %v426_v54 }
  0x89   :  { %vm432_vm10 = vcmp.lt.s32.totalorder %v2004_v36, 1  ;;  %v269_v55 = vmul.f32 %v268_v52, %v266_v4  ;;  %v416_v14 = vshrl.u32 %v1682_v62, %v415_v32  ;;  %v425_v15 = vor.u32 %v424_v51, %v423_v59 }
  0x8a   :  { %v448_v21 = vshll.u32 %v408_v48, 8  ;;  %v2036_v24 = vsub.s32 %v353_v3, %v356_v12  ;;  %v431_v25 = vor.u32 %v430_v8, %v429_v6  ;;  %vm434_vm11 = vcmp.lt.s32.totalorder %v2004_v36, 3 }
  0x8b   :  { %vm435_vm12 = vcmp.lt.s32.totalorder %v2004_v36, 4  ;;  %v270_v22 = vxor.u32 2147483648, %v269_v55  ;;  %vm433_vm13 = vcmp.lt.s32.totalorder %v2004_v36, 2  ;;  %v440_v26 = vsel %vm432_vm10, %v419_v56, %v422_v61 }
  0x8c   :  { %v437_v57 = vsel %vm435_vm12, %v425_v15, 2102212464  ;;  %v173_v27 = vand.u32 3, %v1993_v44  ;;  %v275_v48 = vsel %vm2012_vm9, 0, %v273_v46  ;;  %v359_v28 = vsub.s32 0, %v2036_v24 }
  0x8d   :  { %v441_v20 = vsel %vm435_vm12, %v428_v13, 920167782  ;;  %v271_v29 = vsel %vm188_vm8, %v270_v22, %v269_v55  ;;  %v436_v31 = vsel %vm432_vm10, %v416_v14, %v419_v56  ;;  %v438_v33 = vsel %vm434_vm11, %v422_v61, %v437_v57 }
  0x8e   :  { %v442_v44 = vsel %vm434_vm11, %v425_v15, %v441_v20  ;;  %v274_v32 = vsel %vm2012_vm9, %v1783_v18, %v271_v29  ;;  %v1334_v34 = vmin.u32 %v359_v28, %v2036_v24  ;;  %v444_v58 = vsel %vm432_vm10, %v422_v61, %v425_v15 }
  0x8f   :  { %v443_v35 = vsel %vm433_vm13, %v440_v26, %v442_v44  ;;  %1518 = vcosq.f32 %v274_v32  ;;  %v445_v60 = vsel %vm435_vm12, %v431_v25, 1326507024  ;;  %v279_v40 = vadd.s32 3, %v275_v48 }
  0x90   :  { %v2069_v38 = vmul.u32.u64.low %v448_v21, %v443_v35  ;;  %v2070_v3 = vmul.u32.u64.high %v448_v21, %v443_v35, %v2069_v38  ;;  %1520 = vsinq.f32 %v274_v32  ;;  %v361_v30 = vclz %v1334_v34 }
  0x91   :  { %v1515_v9 = vpop.eup %1514  ;;  %v446_v41 = vsel %vm434_vm11, %v428_v13, %v445_v60  ;;  %vm175_vm14 = vcmp.eq.s32.totalorder %v173_v27, 0  ;;  %v439_v59 = vsel %vm433_vm13, %v436_v31, %v438_v33  ;;  %vm178_vm15 = vcmp.eq.s32.totalorder %v173_v27, 2 }
  0x92   :  { %v1517_v39 = vpop.eup %1516  ;;  %v1335_v43 = vadd.s32 4294967294, %v361_v30  ;;  %v447_v45 = vsel %vm433_vm13, %v444_v58, %v446_v41  ;;  %v179_v51 = vxor.u32 2147483648, %v1515_v9  ;;  %v349_v50 = vadd.s32 %v1988_v63, %v1985_v11 }
  0x93   :  { %v176_v49 = vxor.u32 2147483648, %v1517_v39  ;;  %v2079_v54 = vmul.u32.u64.low %v448_v21, %v447_v45  ;;  %v2080_v23 = vmul.u32.u64.high %v448_v21, %v447_v45, %v2079_v54  ;;  %v458_v52 = vadd.s32 1, %v2070_v3 }
  0x94   :  { %vm1336_vm0 = vcmp.lt.s32.totalorder %v1335_v43, 0  ;;  %v280_v56 = vand.u32 3, %v279_v40  ;;  %v455_v1 = vmul.u32 %v448_v21, %v439_v59  ;;  %vm174_vm1 = vcmp.lt.s32.totalorder %v173_v27, 2 }
  0x95   :  { %v364_v61 = vsel %vm1336_vm0, 0, %v1335_v43  ;;  %v177_v8 = vsel %vm175_vm14, %v1515_v9, %v176_v49  ;;  %v180_v46 = vsel %vm178_vm15, %v179_v51, %v1517_v39  ;;  %vm457_vm2 = vc.u32 %v2080_v23, %v2069_v38 }
  0x96   :  { %v365_v4 = vsub.s32 32, %v364_v61  ;;  %v366_v6 = vshll.u32 %v2036_v24, %v364_v61  ;;  %v369_v36 = vsub.s32 4294967266, %v364_v61  ;;  %v459_v11 = vsel %vm457_vm2, %v458_v52, %v2070_v3 }
  0x97   :  { %vm171_vm3 = vweird.f32 %v1780_v17  ;;  %vm282_vm4 = vcmp.eq.s32.totalorder %v280_v56, 0  ;;  %vm285_vm5 = vcmp.eq.s32.totalorder %v280_v56, 2  ;;  %v460_v55 = vadd.s32 %v459_v11, %v455_v1 }
  0x98   :  { %v367_v12 = vshrl.u32 %v349_v50, %v365_v4  ;;  %v370_v13 = vadd.s32 127, %v369_v36  ;;  %v181_v15 = vsel %vm174_vm1, %v177_v8, %v180_v46  ;;  %vm278_vm6 = vweird.f32 %v1783_v18 }
  0x99   :  { %v1519_v63 = vpop.eup %1518  ;;  %vm281_vm7 = vcmp.lt.s32.totalorder %v280_v56, 2  ;;  %v461_v57 = vadd.s32 536870912, %v460_v55  ;;  %v379_v28 = vsub.s32 4, %v2025_v53  ;;  %v2103_v20 = vsel %vm171_vm3, nan, %v181_v15 }
  0x9a   :  { %v1521_v14 = vpop.eup %1520  ;;  %v286_v21 = vxor.u32 2147483648, %v1519_v63  ;;  %v368_v24 = vor.u32 %v367_v12, %v366_v6  ;;  %v371_v25 = vshll.u32 %v370_v13, 23  ;;  %vm295_vm8 = vcmp.lt.s32.totalorder %v1786_v19, 0 }
  0x9b   :  { %v283_v22 = vxor.u32 2147483648, %v1521_v14  ;;  %v2106_v31 = vshrl.u32 %v461_v57, 30  ;;  %v380_v35 = vsel %vm295_vm8, %v379_v28, %v2025_v53  ;;  %v2124_v58 = vsub.f32 0.0, %v2103_v20 }
  0x9c   :  { %v287_v26 = vsel %vm285_vm5, %v286_v21, %v1521_v14  ;;  %v372_v27 = vor.u32 4788187, %v371_v25  ;;  %v375_v48 = vcvt.s32.f32 %v368_v24  ;;  %v638_v3 = vstv %s2091_s4 }
  0x9d   :  { %v284_v29 = vsel %vm282_vm4, %v1519_v63, %v283_v22  ;;  %v463_v17 = vshll.u32 %v2106_v31, 30  ;;  %v771_v18 = vstv %s2093_s10  ;;  %vm2135_vm9 = vcmp.le.f32.partialorder %v293_v47, 0.7853982 }
  0x9e   :  { %v288_v33 = vsel %vm281_vm7, %v284_v29, %v287_v26  ;;  %v373_v44 = vand.u32 2147483647, %v372_v27  ;;  %v775_v39 = vstv %s2095_s11  ;;  %v382_v40 = vsel %vm2135_vm9, 0, %v380_v35 }
  0x9f   :  { %v2114_v32 = vsel %vm278_vm6, nan, %v288_v33  ;;  %v464_v60 = vsub.s32 %v460_v55, %v463_v17  ;;  %v639_v45 = vmul.f32 %v638_v3, %v2124_v58  ;;  %v772_v47 = vadd.f32 %v771_v18, %v1773_v10 }
  0xa0   :  { %v376_v34 = vmul.f32 %v375_v48, %v373_v44  ;;  %v2131_v9 = vsub.f32 0.0, %v2114_v32  ;;  %v782_v49 = vstv %s2099_s12  ;;  %v789_v52 = vstv %s2108_s13 }
  0xa1   :  { %v466_v41 = vsub.s32 0, %v464_v60  ;;  %v634_v56 = vstv %s2110_s14  ;;  %v783_v61 = vmul.f32 %v782_v49, %v2124_v58  ;;  %v386_v1 = vadd.s32 3, %v382_v40 }
  0xa2   :  { %v377_v53 = vxor.u32 2147483648, %v376_v34  ;;  %v776_v43 = vmul.f32 %v775_v39, %v2131_v9  ;;  %v793_v6 = vstv %s2118_s15  ;;  %v790_v46 = vmul.f32 %v789_v52, %v2103_v20 }
  0xa3   :  { %v1338_v54 = vmin.u32 %v466_v41, %v464_v60  ;;  %v785_v8 = vrot.slane %v783_v61, 7  ;;  %v635_v13 = vadd.f32 %v634_v56, %v1773_v10  ;;  %v641_v11 = vrot.slane %v639_v45, 7 }
  0xa4   :  { %v378_v59 = vsel %vm295_vm8, %v377_v53, %v376_v34  ;;  %v778_v50 = vrot.slane %v776_v43, 6  ;;  %v645_v63 = vstv %s2127_s16  ;;  %v794_v14 = vmul.f32 %v793_v6, %v2114_v32 }
  0xa5   :  { %v381_v51 = vsel %vm2135_vm9, %v1786_v19, %v378_v59  ;;  %v468_v4 = vclz %v1338_v54  ;;  %v387_v15 = vand.u32 3, %v386_v1  ;;  %v456_v21 = vadd.s32 %v2069_v38, %v2080_v23 }
  0xa6   :  { %1522 = vcosq.f32 %v381_v51  ;;  %v780_v36 = vadd.f32 %v778_v50, %v772_v47  ;;  %v646_v25 = vmul.f32 %v645_v63, %v2103_v20  ;;  %v649_v22 = vstv %s2146_s0 }
  0xa7   :  { %1524 = vsinq.f32 %v381_v51  ;;  %v1339_v12 = vadd.s32 4294967294, %v468_v4  ;;  %v643_v28 = vadd.f32 %v641_v11, %v635_v13  ;;  %vm389_vm11 = vcmp.eq.s32.totalorder %v387_v15, 0 }
  0xa8   :  { %v787_v55 = vadd.f32 %v785_v8, %v780_v36  ;;  %vm392_vm12 = vcmp.eq.s32.totalorder %v387_v15, 2  ;;  %v650_v38 = vmul.f32 %v649_v22, %v2114_v32  ;;  %vm385_vm13 = vweird.f32 %v1786_v19 }
  0xa9   :  { %vm1340_vm10 = vcmp.lt.s32.totalorder %v1339_v12, 0  ;;  %v647_v30 = vadd.f32 %v646_v25, %v643_v28  ;;  %vm388_vm14 = vcmp.lt.s32.totalorder %v387_v15, 2  ;;  %v486_v43 = vsub.s32 4, %v2106_v31 }
  0xaa   :  { %v471_v24 = vsel %vm1340_vm10, 0, %v1339_v12  ;;  %v791_v57 = vadd.f32 %v790_v46, %v787_v55  ;;  %v653_v45 = vstv %s2165_s17  ;;  %vm402_vm15 = vcmp.lt.s32.totalorder %v1901_v37, 0 }
  0xab   :  { %v472_v26 = vsub.s32 32, %v471_v24  ;;  %v473_v27 = vshll.u32 %v464_v60, %v471_v24  ;;  %v476_v48 = vsub.s32 4294967266, %v471_v24  ;;  %v651_v54 = vadd.f32 %v650_v38, %v647_v30  ;;  %v1550_v38 = vld [vmem:[#allocation8] sm:$0x1f] }
  0xac   :  { %v795_v29 = vadd.f32 %v794_v14, %v791_v57  ;;  %v487_v61 = vsel %vm402_vm15, %v486_v43, %v2106_v31  ;;  %vm2199_vm0 = vcmp.le.f32.partialorder %v400_v42, 0.7853982  ;;  %v505_v36 = vstv %s2168_s18 }
  0xad   :  { %v474_v33 = vshrl.u32 %v456_v21, %v472_v26  ;;  %v477_v44 = vadd.s32 127, %v476_v48  ;;  %v489_v31 = vsel %vm2199_vm0, 0, %v487_v61  ;;  %v508_v46 = vstv %s2171_s19 }
  0xae   :  { %v796_v23 = vmul.f32 0.15915494, %v795_v29  ;;  %v506_v55 = vadd.f32 %v505_v36, %v1773_v10  ;;  %v915_v15 = vstv %s2176_s20  ;;  %v493_v21 = vadd.s32 3, %v489_v31 }
  0xaf   :  { %v475_v3 = vor.u32 %v474_v33, %v473_v27  ;;  %v478_v18 = vshll.u32 %v477_v44, 23  ;;  %v509_v24 = vmul.f32 %v508_v46, %v2103_v20  ;;  %v512_v22 = vstv %s2183_s21 }
  0xb0   :  { %v1523_v17 = vpop.eup %1522  ;;  %v797_v53 = vfloor.f32 %v796_v23  ;;  %v911_v57 = vstv %s2187_s22  ;;  %v922_v48 = vstv %s2193_s23  ;;  %v494_v28 = vand.u32 3, %v493_v21 }
  0xb1   :  { %v1525_v34 = vpop.eup %1524  ;;  %v393_v35 = vxor.u32 2147483648, %v1523_v17  ;;  %v479_v40 = vor.u32 4788187, %v478_v18  ;;  %v482_v41 = vcvt.s32.f32 %v475_v3  ;;  %v513_v33 = vmul.f32 %v512_v22, %v2114_v32 }
  0xb2   :  { %v390_v60 = vxor.u32 2147483648, %v1525_v34  ;;  %v798_v47 = vmul.f32 6.2831855, %v797_v53  ;;  %v912_v23 = vadd.f32 %v1550_v38, %v911_v57  ;;  %v929_v18 = vstv %s2212_s25 }
  0xb3   :  { %v394_v39 = vsel %vm392_vm12, %v393_v35, %v1525_v34  ;;  %v480_v51 = vand.u32 2147483647, %v479_v40  ;;  %v923_v34 = vmul.f32 %v922_v48, %v2131_v9  ;;  %vm492_vm2 = vweird.f32 %v1901_v37 }
  0xb4   :  { %v391_v59 = vsel %vm389_vm11, %v1523_v17, %v390_v60  ;;  %v2185_v52 = vsub.f32 %v795_v29, %v798_v47  ;;  %v510_v29 = vadd.f32 %v509_v24, %v506_v55  ;;  %v516_v17 = vstv %s2207_s24 }
  0xb5   :  { %v395_v49 = vsel %vm388_vm14, %v391_v59, %v394_v39  ;;  %v483_v56 = vmul.f32 %v482_v41, %v480_v51  ;;  %v520_v30 = vstv %s2218_s26  ;;  %vm499_vm3 = vcmp.eq.s32.totalorder %v494_v28, 2 }
  0xb6   :  { %v2180_v50 = vsel %vm385_vm13, nan, %v395_v49  ;;  %v804_v19 = vand.u32 2139095040, %v2185_v52  ;;  %800 = vst [vmem:[#allocation12] sm:$0x4] %v2185_v52  ;;  %v514_v32 = vadd.f32 %v513_v33, %v510_v29  ;;  %v936_v53 = vstv %s2222_s27 }
  0xb7   :  { %v654_v1 = vmul.f32 %v653_v45, %v2180_v50  ;;  %v484_v6 = vxor.u32 2147483648, %v483_v56  ;;  %v914_v11 = vsub.f32 0.0, %v2180_v50  ;;  %v517_v39 = vmul.f32 %v516_v17, %v2180_v50 }
  0xb8   :  { %v805_v12 = vshrl.u32 %v804_v19, 23  ;;  %v2244_v41 = vmul.f32 %v929_v18, %v2124_v58  ;;  %v1054_v43 = vstv %s2226_s28  ;;  %v801_v47 = vand.u32 2147483647, %v2185_v52 }
  0xb9   :  { %v655_v8 = vadd.f32 %v654_v1, %v651_v54  ;;  %v485_v13 = vsel %vm402_vm15, %v484_v6, %v483_v56  ;;  %v916_v27 = vmul.f32 %v915_v15, %v914_v11  ;;  %v925_v51 = vrot.slane %v923_v34, 6 }
  0xba   :  { %v488_v63 = vsel %vm2199_vm0, %v1901_v37, %v485_v13  ;;  %v1363_v14 = vadd.s32 4294967169, %v805_v12  ;;  %vm495_vm4 = vcmp.lt.s32.totalorder %v494_v28, 2  ;;  %vm496_vm5 = vcmp.eq.s32.totalorder %v494_v28, 0 }
  0xbb   :  { %v656_v42 = vmul.f32 0.15915494, %v655_v8  ;;  %1526 = vcosq.f32 %v488_v63  ;;  %v918_v3 = vrot.slane %v916_v27, 5  ;;  %v2252_v6 = vmul.f32 %v936_v53, %v2103_v20 }
  0xbc   :  { %1528 = vsinq.f32 %v488_v63  ;;  %v811_v26 = vadd.s32 1, %v1363_v14  ;;  %v932_v31 = vrot.slane %v2244_v41, 7  ;;  %v2256_v46 = vadd.f32 %v1550_v38, %v1054_v43 }
  0xbd   :  { %v657_v25 = vfloor.f32 %v656_v42  ;;  %v920_v49 = vadd.f32 %v918_v3, %v912_v23  ;;  %v2260_v13 = vand.u32 8388607, %v801_v47 }
  0xbe   :  { %vm812_vm1 = vcmp.gt.s32.totalorder %v811_v26, 0 }
  0xbf   :  { %v658_v10 = vmul.f32 6.2831855, %v657_v25  ;;  %v813_v40 = vsel %vm812_vm1, %v811_v26, 0  ;;  %v927_v42 = vadd.f32 %v925_v51, %v920_v49 }
  0xc0   :  { %v2249_v4 = vand.u32 31, %v813_v40  ;;  %v2265_v14 = vshrl.u32 %v813_v40, 5 }
  0xc1   :  { %v2232_v44 = vsub.f32 %v655_v8, %v658_v10  ;;  %v518_v8 = vadd.f32 %v517_v39, %v514_v32 }
  0xc2   :  { %v2272_v24 = vsub.s32 32, %v2249_v4  ;;  %v821_v25 = vshll.u32 %v1683_v0, %v2249_v4  ;;  %v824_v10 = vshll.u32 %v1684_v2, %v2249_v4  ;;  %v827_v26 = vshll.u32 %v1685_v5, %v2249_v4 }
  0xc3   :  { %v664_v35 = vand.u32 2139095040, %v2232_v44  ;;  %660 = vst [vmem:[#allocation12] sm:$0x2] %v2232_v44  ;;  %v661_v61 = vand.u32 2147483647, %v2232_v44  ;;  %v830_v38 = vshll.u32 %v1686_v7, %v2249_v4  ;;  %vm836_vm11 = vcmp.lt.s32.totalorder %v2265_v14, 4 }
  0xc4   :  { %v831_v40 = vshrl.u32 %v1687_v16, %v2272_v24  ;;  %v825_v49 = vshrl.u32 %v1685_v5, %v2272_v24  ;;  %vm833_vm12 = vcmp.lt.s32.totalorder %v2265_v14, 1  ;;  %vm835_vm13 = vcmp.lt.s32.totalorder %v2265_v14, 3 }
  0xc5   :  { %v665_v60 = vshrl.u32 %v664_v35, 23  ;;  %v1527_v59 = vpop.eup %1526  ;;  %v668_v20 = vand.u32 8388607, %v661_v61  ;;  %vm834_vm14 = vcmp.lt.s32.totalorder %v2265_v14, 2 }
  0xc6   :  { %v1529_v54 = vpop.eup %1528  ;;  %v500_v56 = vxor.u32 2147483648, %v1527_v59 }
  0xc7   :  { %v1354_v45 = vadd.s32 4294967169, %v665_v60  ;;  %v497_v1 = vxor.u32 2147483648, %v1529_v54  ;;  %v669_v33 = vor.u32 8388608, %v668_v20 }
  0xc8   :  { %v501_v36 = vsel %vm499_vm3, %v500_v56, %v1529_v54 }
  0xc9   :  { %v671_v19 = vadd.s32 1, %v1354_v45  ;;  %v498_v12 = vsel %vm496_vm5, %v1527_v59, %v497_v1  ;;  %v822_v45 = vshrl.u32 %v1684_v2, %v2272_v24  ;;  %v828_v1 = vshrl.u32 %v1686_v7, %v2272_v24 }
  0xca   :  { %v502_v63 = vsel %vm495_vm4, %v498_v12, %v501_v36  ;;  %v2315_v36 = vshll.u32 %v669_v33, 8  ;;  %v1058_v12 = vstv %s2286_s29 }
  0xcb   :  { %vm672_vm6 = vcmp.gt.s32.totalorder %v671_v19, 0  ;;  %v2269_v15 = vsel %vm492_vm2, nan, %v502_v63  ;;  %v829_v33 = vor.u32 %v828_v1, %v827_v26 }
  0xcc   :  { %v673_v55 = vsel %vm672_vm6, %v671_v19, 0  ;;  %v521_v22 = vmul.f32 %v520_v30, %v2269_v15 }
  0xcd   :  { %v675_v21 = vand.u32 31, %v673_v55  ;;  %v2277_v57 = vshrl.u32 %v673_v55, 5  ;;  %v832_v55 = vor.u32 %v831_v40, %v830_v38 }
  0xce   :  { %v522_v29 = vadd.f32 %v521_v22, %v518_v8  ;;  %v809_v8 = vor.u32 8388608, %v2260_v13  ;;  %v818_v22 = vshll.u32 %v1682_v62, %v2249_v4 }
  0xcf   :  { %v676_v37 = vsub.s32 32, %v675_v21  ;;  %v678_v27 = vshll.u32 %v1682_v62, %v675_v21  ;;  %v681_v48 = vshll.u32 %v1683_v0, %v675_v21  ;;  %v684_v28 = vshll.u32 %v1684_v2, %v675_v21 }
  0xd0   :  { %v687_v17 = vshll.u32 %v1685_v5, %v675_v21  ;;  %v690_v3 = vshll.u32 %v1686_v7, %v675_v21  ;;  %v523_v18 = vmul.f32 0.15915494, %v522_v29  ;;  %vm693_vm7 = vcmp.lt.s32.totalorder %v2277_v57, 1 }
  0xd1   :  { %v679_v23 = vshrl.u32 %v1683_v0, %v676_v37  ;;  %v682_v34 = vshrl.u32 %v1684_v2, %v676_v37  ;;  %v685_v35 = vshrl.u32 %v1685_v5, %v676_v37  ;;  %v688_v30 = vshrl.u32 %v1686_v7, %v676_v37 }
  0xd2   :  { %v691_v32 = vshrl.u32 %v1687_v16, %v676_v37  ;;  %v524_v41 = vfloor.f32 %v523_v18  ;;  %vm695_vm8 = vcmp.lt.s32.totalorder %v2277_v57, 3  ;;  %vm696_vm9 = vcmp.lt.s32.totalorder %v2277_v57, 4 }
  0xd3   :  { %v680_v60 = vor.u32 %v679_v23, %v678_v27  ;;  %v683_v53 = vor.u32 %v682_v34, %v681_v48  ;;  %v686_v39 = vor.u32 %v685_v35, %v684_v28  ;;  %v689_v43 = vor.u32 %v688_v30, %v687_v17 }
  0xd4   :  { %vm694_vm10 = vcmp.lt.s32.totalorder %v2277_v57, 2  ;;  %v525_v51 = vmul.f32 6.2831855, %v524_v41  ;;  %v692_v54 = vor.u32 %v691_v32, %v690_v3  ;;  %v934_v21 = vadd.f32 %v932_v31, %v927_v42 }
  0xd5   :  { %v701_v59 = vsel %vm693_vm7, %v680_v60, %v683_v53  ;;  %v702_v56 = vsel %vm696_vm9, %v689_v43, 920167782  ;;  %v819_v27 = vshrl.u32 %v1683_v0, %v2272_v24  ;;  %v2327_v48 = vor.u32 %v822_v45, %v821_v25 }
  0xd6   :  { %v703_v19 = vsel %vm695_vm8, %v686_v39, %v702_v56  ;;  %v2319_v63 = vsub.f32 %v522_v29, %v525_v51  ;;  %v706_v28 = vsel %vm696_vm9, %v692_v54, 1326507024  ;;  %v826_v29 = vor.u32 %v825_v49, %v824_v10 }
  0xd7   :  { %v704_v20 = vsel %vm694_vm10, %v701_v59, %v703_v19  ;;  %v677_v4 = vshrl.u32 %v1682_v62, %v676_v37  ;;  %v846_v10 = vsel %vm836_vm11, %v832_v55, 1326507024  ;;  %v698_v26 = vsel %vm696_vm9, %v686_v39, 2102212464 }
  0xd8   :  { %v531_v13 = vand.u32 2139095040, %v2319_v63  ;;  %527 = vst [vmem:[#allocation12] sm:$0x1] %v2319_v63  ;;  %v2338_v31 = vmul.u32.u64.low %v2315_v36, %v704_v20  ;;  %v2339_v42 = vmul.u32.u64.high %v2315_v36, %v704_v20, %v2338_v31  ;;  %v528_v25 = vand.u32 2147483647, %v2319_v63 }
  0xd9   :  { %v705_v37 = vsel %vm693_vm7, %v683_v53, %v686_v39  ;;  %v707_v38 = vsel %vm695_vm8, %v689_v43, %v706_v28  ;;  %v820_v23 = vor.u32 %v819_v27, %v818_v22  ;;  %v817_v35 = vshrl.u32 %v1682_v62, %v2272_v24 }
  0xda   :  { %v532_v17 = vshrl.u32 %v531_v13, 23  ;;  %v842_v3 = vsel %vm836_vm11, %v829_v33, 920167782  ;;  %v2358_v18 = vadd.f32 %v2252_v6, %v934_v21  ;;  %v697_v30 = vsel %vm693_vm7, %v677_v4, %v680_v60 }
  0xdb   :  { %v845_v32 = vsel %vm833_vm12, %v2327_v48, %v826_v29  ;;  %v847_v39 = vsel %vm835_vm13, %v829_v33, %v846_v10  ;;  %v535_v24 = vand.u32 8388607, %v528_v25  ;;  %v699_v6 = vsel %vm695_vm8, %v683_v53, %v698_v26 }
  0xdc   :  { %v1345_v34 = vadd.s32 4294967169, %v532_v17  ;;  %v708_v41 = vsel %vm694_vm10, %v705_v37, %v707_v38  ;;  %v841_v60 = vsel %vm833_vm12, %v820_v23, %v2327_v48  ;;  %v843_v43 = vsel %vm835_vm13, %v826_v29, %v842_v3 }
  0xdd   :  { %v2379_v59 = vshll.u32 %v809_v8, 8  ;;  %v1065_v45 = vstv %s2330_s30  ;;  %v2384_v49 = vsel %vm833_vm12, %v817_v35, %v820_v23  ;;  %v838_v53 = vsel %vm836_vm11, %v826_v29, 2102212464 }
  0xde   :  { %v538_v40 = vadd.s32 1, %v1345_v34  ;;  %v848_v51 = vsel %vm834_vm14, %v845_v32, %v847_v39  ;;  %v700_v56 = vsel %vm694_vm10, %v697_v30, %v699_v6  ;;  %v536_v8 = vor.u32 8388608, %v535_v24 }
  0xdf   :  { %v2393_v1 = vmul.u32.u64.low %v2315_v36, %v708_v41  ;;  %v2394_v19 = vmul.u32.u64.high %v2315_v36, %v708_v41, %v2393_v1  ;;  %v719_v55 = vadd.s32 1, %v2339_v42  ;;  %v844_v21 = vsel %vm834_vm14, %v841_v60, %v843_v43 }
  0xe0   :  { %vm539_vm15 = vcmp.gt.s32.totalorder %v538_v40, 0  ;;  %v2402_v27 = vmul.u32.u64.low %v2379_v59, %v848_v51  ;;  %v2403_v13 = vmul.u32.u64.high %v2379_v59, %v848_v51, %v2402_v27  ;;  %v939_v57 = vmul.f32 0.15915494, %v2358_v18 }
  0xe1   :  { %v540_v54 = vsel %vm539_vm15, %v538_v40, 0  ;;  %v2412_v26 = vmul.u32.u64.low %v2379_v59, %v844_v21  ;;  %v2413_v37 = vmul.u32.u64.high %v2379_v59, %v844_v21, %v2412_v26  ;;  %v1057_v35 = vsub.f32 0.0, %v2269_v15 }
  0xe2   :  { %v542_v20 = vand.u32 31, %v540_v54  ;;  %v2399_v22 = vshrl.u32 %v540_v54, 5  ;;  %v940_v32 = vfloor.f32 %v939_v57  ;;  %vm718_vm3 = vc.u32 %v2394_v19, %v2338_v31 }
  0xe3   :  { %v576_v43 = vshll.u32 %v536_v8, 8  ;;  %v716_v1 = vmul.u32 %v2315_v36, %v700_v56  ;;  %v720_v57 = vsel %vm718_vm3, %v719_v55, %v2339_v42  ;;  %v1059_v8 = vmul.f32 %v1058_v12, %v1057_v35 }
  0xe4   :  { %v543_v28 = vsub.s32 32, %v542_v20  ;;  %v545_v29 = vshll.u32 %v1682_v62, %v542_v20  ;;  %v548_v33 = vshll.u32 %v1683_v0, %v542_v20  ;;  %v551_v4 = vshll.u32 %v1684_v2, %v542_v20 }
  0xe5   :  { %v554_v17 = vshll.u32 %v1685_v5, %v542_v20  ;;  %v557_v10 = vshll.u32 %v1686_v7, %v542_v20  ;;  %vm560_vm0 = vcmp.lt.s32.totalorder %v2399_v22, 1  ;;  %vm563_vm1 = vcmp.lt.s32.totalorder %v2399_v22, 4 }
  0xe6   :  { %v546_v38 = vshrl.u32 %v1683_v0, %v543_v28  ;;  %v549_v23 = vshrl.u32 %v1684_v2, %v543_v28  ;;  %v552_v34 = vshrl.u32 %v1685_v5, %v543_v28  ;;  %v555_v3 = vshrl.u32 %v1686_v7, %v543_v28 }
  0xe7   :  { %v558_v30 = vshrl.u32 %v1687_v16, %v543_v28  ;;  %vm562_vm2 = vcmp.lt.s32.totalorder %v2399_v22, 3  ;;  %vm561_vm4 = vcmp.lt.s32.totalorder %v2399_v22, 2  ;;  %v941_v20 = vmul.f32 6.2831855, %v940_v32 }
  0xe8   :  { %v547_v39 = vor.u32 %v546_v38, %v545_v29  ;;  %v550_v24 = vor.u32 %v549_v23, %v548_v33  ;;  %v553_v40 = vor.u32 %v552_v34, %v551_v4  ;;  %v556_v6 = vor.u32 %v555_v3, %v554_v17 }
  0xe9   :  { %v559_v41 = vor.u32 %v558_v30, %v557_v10  ;;  %v544_v29 = vshrl.u32 %v1682_v62, %v543_v28  ;;  %v839_v33 = vsel %vm835_vm13, %v2327_v48, %v838_v53  ;;  %v721_v28 = vadd.s32 %v720_v57, %v716_v1 }
  0xea   :  { %v568_v15 = vsel %vm560_vm0, %v547_v39, %v550_v24  ;;  %v572_v60 = vsel %vm560_vm0, %v550_v24, %v553_v40  ;;  %v569_v51 = vsel %vm563_vm1, %v556_v6, 920167782  ;;  %v565_v12 = vsel %vm563_vm1, %v553_v40, 2102212464 }
  0xeb   :  { %v573_v54 = vsel %vm563_vm1, %v559_v41, 1326507024  ;;  %v570_v21 = vsel %vm562_vm2, %v553_v40, %v569_v51  ;;  %v2466_v10 = vsub.f32 %v2358_v18, %v941_v20  ;;  %v1072_v38 = vstv %s2423_s7 }
  0xec   :  { %v574_v27 = vsel %vm562_vm2, %v556_v6, %v573_v54  ;;  %v571_v36 = vsel %vm561_vm4, %v568_v15, %v570_v21  ;;  %v840_v48 = vsel %vm834_vm14, %v2384_v49, %v839_v33  ;;  %v859_v53 = vadd.s32 1, %v2413_v37 }
  0xed   :  { %v575_v56 = vsel %vm561_vm4, %v572_v60, %v574_v27  ;;  %v2459_v42 = vmul.u32.u64.low %v576_v43, %v571_v36  ;;  %v2460_v55 = vmul.u32.u64.high %v576_v43, %v571_v36, %v2459_v42  ;;  %v1061_v23 = vrot.slane %v1059_v8, 4  ;;  %943 = vst [vmem:[#allocation12] sm:$0x8] %v2466_v10 }
  0xee   :  { %v2456_v4 = vmul.u32.u64.low %v576_v43, %v575_v56  ;;  %v2457_v17 = vmul.u32.u64.high %v576_v43, %v575_v56, %v2456_v4  ;;  %v1066_v34 = vmul.f32 %v1065_v45, %v914_v11  ;;  %vm858_vm5 = vc.u32 %v2403_v13, %v2412_v26 }
  0xef   :  { %v564_v18 = vsel %vm560_vm0, %v544_v29, %v547_v39  ;;  %v566_v14 = vsel %vm562_vm2, %v550_v24, %v565_v12  ;;  %v722_v35 = vadd.s32 536870912, %v721_v28  ;;  %v856_v49 = vmul.u32 %v2379_v59, %v840_v48 }
  0xf0   :  { %v947_v3 = vand.u32 2139095040, %v2466_v10  ;;  %v1073_v50 = vmul.f32 %v1072_v38, %v2131_v9  ;;  %v860_v11 = vsel %vm858_vm5, %v859_v53, %v2413_v37  ;;  %v1063_v45 = vadd.f32 %v1061_v23, %v2256_v46 }
  0xf1   :  { %v1068_v30 = vrot.slane %v1066_v34, 5  ;;  %v1079_v32 = vstv %s2446_s2  ;;  %v567_v40 = vsel %vm561_vm4, %v564_v18, %v566_v14  ;;  %v586_v39 = vadd.s32 1, %v2460_v55 }
  0xf2   :  { %vm585_vm6 = vc.u32 %v2457_v17, %v2459_v42  ;;  %v948_v24 = vshrl.u32 %v947_v3, 23  ;;  %v2495_v59 = vshrl.u32 %v722_v35, 30  ;;  %v861_v6 = vadd.s32 %v860_v11, %v856_v49 }
  0xf3   :  { %v1080_v9 = vmul.f32 %v1079_v32, %v2124_v58  ;;  %v583_v41 = vmul.u32 %v576_v43, %v567_v40  ;;  %v1070_v15 = vadd.f32 %v1068_v30, %v1063_v45  ;;  %v1075_v46 = vrot.slane %v1073_v50, 6 }
  0xf4   :  { %v1372_v37 = vadd.s32 4294967169, %v948_v24  ;;  %v587_v60 = vsel %vm585_vm6, %v586_v39, %v2460_v55  ;;  %v724_v22 = vshll.u32 %v2495_v59, 30  ;;  %v862_v54 = vadd.s32 536870912, %v861_v6 }
  0xf5   :  { %v588_v1 = vadd.s32 %v587_v60, %v583_v41  ;;  %v1077_v20 = vadd.f32 %v1075_v46, %v1070_v15  ;;  %v1082_v21 = vrot.slane %v1080_v9, 7  ;;  %v944_v4 = vand.u32 2147483647, %v2466_v10 }
  0xf6   :  { %v954_v51 = vadd.s32 1, %v1372_v37  ;;  %v2500_v27 = vsub.s32 %v721_v28, %v724_v22  ;;  %v2502_v57 = vshrl.u32 %v862_v54, 30 }
  0xf7   :  { %v589_v8 = vadd.s32 536870912, %v588_v1  ;;  %v2504_v43 = vadd.f32 %v1082_v21, %v1077_v20  ;;  %v951_v48 = vand.u32 8388607, %v944_v4 }
  0xf8   :  { %vm955_vm7 = vcmp.gt.s32.totalorder %v954_v51, 0  ;;  %v727_v36 = vsub.s32 0, %v2500_v27  ;;  %v864_v56 = vshll.u32 %v2502_v57, 30 }
  0xf9   :  { %v956_v58 = vsel %vm955_vm7, %v954_v51, 0  ;;  %v2508_v33 = vshrl.u32 %v589_v8, 30  ;;  %v952_v30 = vor.u32 8388608, %v951_v48  ;;  %vm663_vm7 = vcmp.lt.s32.totalorder %v2232_v44, 0 }
  0xfa   :  { %v958_v29 = vand.u32 31, %v956_v58  ;;  %v1355_v12 = vmin.u32 %v727_v36, %v2500_v27  ;;  %v2512_v28 = vsub.s32 %v861_v6, %v864_v56  ;;  %v957_v14 = vshrl.u32 %v956_v58, 5 }
  0xfb   :  { %v591_v38 = vshll.u32 %v2508_v33, 30  ;;  %v992_v51 = vshll.u32 %v952_v30, 8  ;;  %v1085_v36 = vmul.f32 0.15915494, %v2504_v43 }
  0xfc   :  { %v959_v55 = vsub.s32 32, %v958_v29  ;;  %v961_v53 = vshll.u32 %v1682_v62, %v958_v29  ;;  %v964_v34 = vshll.u32 %v1683_v0, %v958_v29  ;;  %v967_v35 = vshll.u32 %v1684_v2, %v958_v29 }
  0xfd   :  { %v729_v49 = vclz %v1355_v12  ;;  %v867_v3 = vsub.s32 0, %v2512_v28  ;;  %v970_v11 = vshll.u32 %v1685_v5, %v958_v29  ;;  %v2525_v45 = vsub.s32 %v588_v1, %v591_v38 }
  0xfe   :  { %v962_v23 = vshrl.u32 %v1683_v0, %v959_v55  ;;  %v965_v18 = vshrl.u32 %v1684_v2, %v959_v55  ;;  %v968_v50 = vshrl.u32 %v1685_v5, %v959_v55  ;;  %v971_v32 = vshrl.u32 %v1686_v7, %v959_v55 }
  0xff   :  { %v973_v40 = vshll.u32 %v1686_v7, %v958_v29  ;;  %v974_v6 = vshrl.u32 %v1687_v16, %v959_v55  ;;  %vm976_vm8 = vcmp.lt.s32.totalorder %v957_v14, 1  ;;  %v1364_v37 = vmin.u32 %v867_v3, %v2512_v28 }
 0x100   :  { %v963_v39 = vor.u32 %v962_v23, %v961_v53  ;;  %v966_v24 = vor.u32 %v965_v18, %v964_v34  ;;  %v969_v9 = vor.u32 %v968_v50, %v967_v35  ;;  %v972_v41 = vor.u32 %v971_v32, %v970_v11 }
 0x101   :  { %v975_v15 = vor.u32 %v974_v6, %v973_v40  ;;  %vm978_vm9 = vcmp.lt.s32.totalorder %v957_v14, 3  ;;  %v594_v46 = vsub.s32 0, %v2525_v45  ;;  %v1356_v60 = vadd.s32 4294967294, %v729_v49 }
 0x102   :  { %vm979_vm10 = vcmp.lt.s32.totalorder %v957_v14, 4  ;;  %v960_v22 = vshrl.u32 %v1682_v62, %v959_v55  ;;  %vm977_vm11 = vcmp.lt.s32.totalorder %v957_v14, 2  ;;  %v984_v54 = vsel %vm976_vm8, %v963_v39, %v966_v24 }
 0x103   :  { %v985_v1 = vsel %vm979_vm10, %v972_v41, 920167782  ;;  %v981_v20 = vsel %vm979_vm10, %v969_v9, 2102212464  ;;  %v988_v8 = vsel %vm976_vm8, %v966_v24, %v969_v9  ;;  %v989_v58 = vsel %vm979_vm10, %v975_v15, 1326507024 }
 0x104   :  { %v986_v21 = vsel %vm978_vm9, %v969_v9, %v985_v1  ;;  %v869_v29 = vclz %v1364_v37  ;;  %v1346_v56 = vmin.u32 %v594_v46, %v2525_v45  ;;  %vm1357_vm12 = vcmp.lt.s32.totalorder %v1356_v60, 0 }
 0x105   :  { %v990_v12 = vsel %vm978_vm9, %v972_v41, %v989_v58  ;;  %v980_v55 = vsel %vm976_vm8, %v960_v22, %v963_v39  ;;  %v982_v38 = vsel %vm978_vm9, %v966_v24, %v981_v20  ;;  %v987_v48 = vsel %vm977_vm11, %v984_v54, %v986_v21 }
 0x106   :  { %v991_v53 = vsel %vm977_vm11, %v988_v8, %v990_v12  ;;  %v732_v18 = vsel %vm1357_vm12, 0, %v1356_v60  ;;  %v1365_v35 = vadd.s32 4294967294, %v869_v29  ;;  %v1086_v49 = vfloor.f32 %v1085_v36 }
 0x107   :  { %v2543_v23 = vmul.u32.u64.low %v992_v51, %v991_v53  ;;  %v2544_v34 = vmul.u32.u64.high %v992_v51, %v991_v53, %v2543_v23  ;;  %v596_v3 = vclz %v1346_v56  ;;  %v983_v50 = vsel %vm977_vm11, %v980_v55, %v982_v38 }
 0x108   :  { %v2547_v11 = vmul.u32.u64.low %v992_v51, %v987_v48  ;;  %v2548_v30 = vmul.u32.u64.high %v992_v51, %v987_v48, %v2547_v11  ;;  %v1087_v32 = vmul.f32 6.2831855, %v1086_v49  ;;  %v737_v40 = vsub.s32 4294967266, %v732_v18 }
 0x109   :  { %vm1366_vm13 = vcmp.lt.s32.totalorder %v1365_v35, 0  ;;  %v999_v39 = vmul.u32 %v992_v51, %v983_v50  ;;  %v1347_v6 = vadd.s32 4294967294, %v596_v3  ;;  %v717_v41 = vadd.s32 %v2338_v31, %v2394_v19 }
 0x10a   :  { %vm1001_vm14 = vc.u32 %v2544_v34, %v2547_v11  ;;  %v2554_v24 = vsub.f32 %v2504_v43, %v1087_v32  ;;  %v1002_v9 = vadd.s32 1, %v2548_v30  ;;  %v733_v37 = vsub.s32 32, %v732_v18 }
 0x10b   :  { %v872_v15 = vsel %vm1366_vm13, 0, %v1365_v35  ;;  %v738_v60 = vadd.s32 127, %v737_v40  ;;  %vm1348_vm15 = vcmp.lt.s32.totalorder %v1347_v6, 0  ;;  %v734_v20 = vshll.u32 %v2500_v27, %v732_v18 }
 0x10c   :  { %v1093_v14 = vand.u32 2139095040, %v2554_v24  ;;  %1089 = vst [vmem:[#allocation12] sm:$0x10] %v2554_v24  ;;  %v1003_v46 = vsel %vm1001_vm14, %v1002_v9, %v2548_v30  ;;  %v877_v43 = vsub.s32 4294967266, %v872_v15  ;;  %v735_v21 = vshrl.u32 %v717_v41, %v733_v37 }
 0x10d   :  { %v1004_v51 = vadd.s32 %v1003_v46, %v999_v39  ;;  %v599_v8 = vsel %vm1348_vm15, 0, %v1347_v6  ;;  %v739_v58 = vshll.u32 %v738_v60, 23  ;;  %v857_v31 = vadd.s32 %v2412_v26, %v2403_v13 }
 0x10e   :  { %v1094_v22 = vshrl.u32 %v1093_v14, 23  ;;  %v873_v19 = vsub.s32 32, %v872_v15  ;;  %v584_v56 = vadd.s32 %v2459_v42, %v2457_v17  ;;  %v600_v12 = vsub.s32 32, %v599_v8 }
 0x10f   :  { %v1005_v54 = vadd.s32 536870912, %v1004_v51  ;;  %v878_v55 = vadd.s32 127, %v877_v43  ;;  %v604_v48 = vsub.s32 4294967266, %v599_v8  ;;  %v1090_v27 = vand.u32 2147483647, %v2554_v24 }
 0x110   :  { %v1381_v1 = vadd.s32 4294967169, %v1094_v22  ;;  %v2571_v53 = vor.u32 %v735_v21, %v734_v20  ;;  %v2573_v23 = vor.u32 4788187, %v739_v58  ;;  %v874_v13 = vshll.u32 %v2512_v28, %v872_v15 }
 0x111   :  { %v2563_v29 = vshrl.u32 %v1005_v54, 30  ;;  %v875_v26 = vshrl.u32 %v857_v31, %v873_v19  ;;  %v601_v17 = vshll.u32 %v2525_v45, %v599_v8  ;;  %v602_v42 = vshrl.u32 %v584_v56, %v600_v12 }
 0x112   :  { %v1100_v36 = vadd.s32 1, %v1381_v1  ;;  %v879_v49 = vshll.u32 %v878_v55, 23  ;;  %v605_v50 = vadd.s32 127, %v604_v48  ;;  %v1097_v30 = vand.u32 8388607, %v1090_v27 }
 0x113   :  { %v1007_v38 = vshll.u32 %v2563_v29, 30  ;;  %v741_v40 = vand.u32 2147483647, %v2573_v23  ;;  %v743_v39 = vcvt.s32.f32 %v2571_v53  ;;  %v2585_v28 = vor.u32 %v875_v26, %v874_v13 }
 0x114   :  { %vm1101_vm0 = vcmp.gt.s32.totalorder %v1100_v36, 0  ;;  %v2589_v41 = vor.u32 %v602_v42, %v601_v17  ;;  %v880_v37 = vor.u32 4788187, %v879_v49  ;;  %v606_v60 = vshll.u32 %v605_v50, 23 }
 0x115   :  { %v2575_v18 = vsub.s32 %v1004_v51, %v1007_v38  ;;  %v1102_v35 = vsel %vm1101_vm0, %v1100_v36, 0  ;;  %v1098_v51 = vor.u32 8388608, %v1097_v30  ;;  %v1000_v56 = vadd.s32 %v2547_v11, %v2544_v34 }
 0x116   :  { %v1104_v32 = vand.u32 31, %v1102_v35  ;;  %v1103_v46 = vshrl.u32 %v1102_v35, 5  ;;  %v607_v17 = vor.u32 4788187, %v606_v60  ;;  %v744_v60 = vmul.f32 %v743_v39, %v741_v40 }
 0x117   :  { %v1010_v3 = vsub.s32 0, %v2575_v18  ;;  %v1138_v53 = vshll.u32 %v1098_v51, 8  ;;  %vm2628_vm8 = vcmp.le.f32.partialorder %v661_v61, 0.7853982  ;;  %vm803_vm9 = vcmp.lt.s32.totalorder %v2185_v52, 0 }
 0x118   :  { %v1105_v9 = vsub.s32 32, %v1104_v32  ;;  %v1107_v45 = vshll.u32 %v1682_v62, %v1104_v32  ;;  %v1110_v14 = vshll.u32 %v1683_v0, %v1104_v32  ;;  %v1113_v1 = vshll.u32 %v1684_v2, %v1104_v32 }
 0x119   :  { %v1373_v6 = vmin.u32 %v1010_v3, %v2575_v18  ;;  %v1116_v21 = vshll.u32 %v1685_v5, %v1104_v32  ;;  %v1119_v31 = vshll.u32 %v1686_v7, %v1104_v32  ;;  %vm1122_vm2 = vcmp.lt.s32.totalorder %v1103_v46, 1 }
 0x11a   :  { %v1108_v22 = vshrl.u32 %v1683_v0, %v1105_v9  ;;  %v1111_v43 = vshrl.u32 %v1684_v2, %v1105_v9  ;;  %v1114_v20 = vshrl.u32 %v1685_v5, %v1105_v9  ;;  %v1117_v36 = vshrl.u32 %v1686_v7, %v1105_v9 }
 0x11b   :  { %v1012_v15 = vclz %v1373_v6  ;;  %v1106_v19 = vshrl.u32 %v1682_v62, %v1105_v9  ;;  %v1120_v0 = vshrl.u32 %v1687_v16, %v1105_v9  ;;  %vm1124_vm3 = vcmp.lt.s32.totalorder %v1103_v46, 3 }
 0x11c   :  { %v1109_v8 = vor.u32 %v1108_v22, %v1107_v45  ;;  %v1112_v58 = vor.u32 %v1111_v43, %v1110_v14  ;;  %v1115_v12 = vor.u32 %v1114_v20, %v1113_v1  ;;  %v1118_v55 = vor.u32 %v1117_v36, %v1116_v21 }
 0x11d   :  { %v1374_v54 = vadd.s32 4294967294, %v1012_v15  ;;  %v1121_v48 = vor.u32 %v1120_v0, %v1119_v31  ;;  %vm1123_vm4 = vcmp.lt.s32.totalorder %v1103_v46, 2  ;;  %vm1125_vm5 = vcmp.lt.s32.totalorder %v1103_v46, 4 }
 0x11e   :  { %v1130_v7 = vsel %vm1122_vm2, %v1109_v8, %v1112_v58  ;;  %v1126_v62 = vsel %vm1122_vm2, %v1106_v19, %v1109_v8  ;;  %v1127_v16 = vsel %vm1125_vm5, %v1115_v12, 2102212464  ;;  %v1131_v13 = vsel %vm1125_vm5, %v1118_v55, 920167782 }
 0x11f   :  { %vm1375_vm1 = vcmp.lt.s32.totalorder %v1374_v54, 0  ;;  %v1128_v26 = vsel %vm1124_vm3, %v1112_v58, %v1127_v16  ;;  %v1132_v34 = vsel %vm1124_vm3, %v1115_v12, %v1131_v13  ;;  %v1134_v11 = vsel %vm1122_vm2, %v1112_v58, %v1115_v12 }
 0x120   :  { %v1015_v2 = vsel %vm1375_vm1, 0, %v1374_v54  ;;  %v1135_v35 = vsel %vm1125_vm5, %v1121_v48, 1326507024  ;;  %v1133_v3 = vsel %vm1123_vm4, %v1130_v7, %v1132_v34  ;;  %v881_v9 = vand.u32 2147483647, %v880_v37 }
 0x121   :  { %v1016_v38 = vsub.s32 32, %v1015_v2  ;;  %v1020_v5 = vsub.s32 4294967266, %v1015_v2  ;;  %v1017_v42 = vshll.u32 %v2575_v18, %v1015_v2  ;;  %v1136_v30 = vsel %vm1124_vm3, %v1118_v55, %v1135_v35 }
 0x122   :  { %v2610_v32 = vmul.u32.u64.low %v1138_v53, %v1133_v3  ;;  %v2611_v6 = vmul.u32.u64.high %v1138_v53, %v1133_v3, %v2610_v32  ;;  %v883_v45 = vcvt.s32.f32 %v2585_v28  ;;  %v1129_v14 = vsel %vm1123_vm4, %v1126_v62, %v1128_v26 }
 0x123   :  { %v1021_v23 = vadd.s32 127, %v1020_v5  ;;  %v1018_v49 = vshrl.u32 %v1000_v56, %v1016_v38  ;;  %v1137_v15 = vsel %vm1123_vm4, %v1134_v11, %v1136_v30  ;;  %v608_v22 = vand.u32 2147483647, %v607_v17 }
 0x124   :  { %v2617_v51 = vmul.u32.u64.low %v1138_v53, %v1137_v15  ;;  %v2618_v18 = vmul.u32.u64.high %v1138_v53, %v1137_v15, %v2617_v51  ;;  %v610_v43 = vcvt.s32.f32 %v2589_v41  ;;  %v1145_v20 = vmul.u32 %v1138_v53, %v1129_v14 }
 0x125   :  { %v1022_v50 = vshll.u32 %v1021_v23, 23  ;;  %v1019_v54 = vor.u32 %v1018_v49, %v1017_v42  ;;  %v1148_v21 = vadd.s32 1, %v2611_v6  ;;  %v884_v8 = vmul.f32 %v883_v45, %v881_v9 }
 0x126   :  { %v745_v37 = vxor.u32 2147483648, %v744_v60  ;;  %vm1147_vm6 = vc.u32 %v2618_v18, %v2610_v32  ;;  %v611_v28 = vmul.f32 %v610_v43, %v608_v22  ;;  %v747_v56 = vsub.s32 4, %v2495_v59 }
 0x127   :  { %v1023_v1 = vor.u32 4788187, %v1022_v50  ;;  %v1149_v40 = vsel %vm1147_vm6, %v1148_v21, %v2611_v6  ;;  %v1026_v46 = vcvt.s32.f32 %v1019_v54  ;;  %v885_v36 = vxor.u32 2147483648, %v884_v8 }
 0x128   :  { %v1150_v58 = vadd.s32 %v1149_v40, %v1145_v20  ;;  %v746_v31 = vsel %vm663_vm7, %v745_v37, %v744_v60  ;;  %v612_v0 = vxor.u32 2147483648, %v611_v28  ;;  %vm530_vm10 = vcmp.lt.s32.totalorder %v2319_v63, 0 }
 0x129   :  { %v1024_v39 = vand.u32 2147483647, %v1023_v1  ;;  %v749_v61 = vsel %vm2628_vm8, %v2232_v44, %v746_v31  ;;  %vm2644_vm11 = vcmp.le.f32.partialorder %v801_v47, 0.7853982  ;;  %v886_v38 = vsel %vm803_vm9, %v885_v36, %v884_v8 }
 0x12a   :  { %v1151_v19 = vadd.s32 536870912, %v1150_v58  ;;  %vm2653_vm12 = vcmp.le.f32.partialorder %v528_v25, 0.7853982  ;;  %v613_v7 = vsel %vm530_vm10, %v612_v0, %v611_v28  ;;  %v748_v47 = vsel %vm663_vm7, %v747_v56, %v2495_v59 }
 0x12b   :  { %v1027_v2 = vmul.f32 %v1026_v46, %v1024_v39  ;;  %v887_v53 = vsub.s32 4, %v2502_v57  ;;  %1530 = vcosq.f32 %v749_v61  ;;  %v889_v23 = vsel %vm2644_vm11, %v2185_v52, %v886_v38 }
 0x12c   :  { %v2637_v12 = vshrl.u32 %v1151_v19, 30  ;;  %1532 = vsinq.f32 %v749_v61  ;;  %vm946_vm13 = vcmp.lt.s32.totalorder %v2466_v10, 0  ;;  %v614_v25 = vsub.s32 4, %v2508_v33 }
 0x12d   :  { %v1028_v62 = vxor.u32 2147483648, %v1027_v2  ;;  %v616_v13 = vsel %vm2653_vm12, %v2319_v63, %v613_v7  ;;  %v750_v59 = vsel %vm2628_vm8, 0, %v748_v47  ;;  %v888_v34 = vsel %vm803_vm9, %v887_v53, %v2502_v57 }
 0x12e   :  { %v1153_v5 = vshll.u32 %v2637_v12, 30  ;;  %1534 = vcosq.f32 %v889_v23  ;;  %vm2678_vm14 = vcmp.le.f32.partialorder %v944_v4, 0.7853982  ;;  %v615_v42 = vsel %vm530_vm10, %v614_v25, %v2508_v33 }
 0x12f   :  { %1536 = vsinq.f32 %v889_v23  ;;  %v1029_v35 = vsel %vm946_vm13, %v1028_v62, %v1027_v2  ;;  %v890_v57 = vsel %vm2644_vm11, 0, %v888_v34  ;;  %v754_v3 = vadd.s32 3, %v750_v59 }
 0x130   :  { %v1154_v16 = vsub.s32 %v1150_v58, %v1153_v5  ;;  %1538 = vcosq.f32 %v616_v13  ;;  %v1030_v4 = vsub.s32 4, %v2563_v29  ;;  %v1032_v50 = vsel %vm2678_vm14, %v2466_v10, %v1029_v35 }
 0x131   :  { %1540 = vsinq.f32 %v616_v13  ;;  %v617_v6 = vsel %vm2653_vm12, 0, %v615_v42  ;;  %v894_v9 = vadd.s32 3, %v890_v57  ;;  %v1146_v33 = vadd.s32 %v2610_v32, %v2618_v18 }
 0x132   :  { %v1156_v26 = vsub.s32 0, %v1154_v16  ;;  %1542 = vcosq.f32 %v1032_v50  ;;  %v755_v15 = vand.u32 3, %v754_v3  ;;  %v1031_v60 = vsel %vm946_vm13, %v1030_v4, %v2563_v29 }
 0x133   :  { %1544 = vsinq.f32 %v1032_v50  ;;  %v621_v22 = vadd.s32 3, %v617_v6  ;;  %v895_v8 = vand.u32 3, %v894_v9  ;;  %v1033_v32 = vsel %vm2678_vm14, 0, %v1031_v60 }
 0x134   :  { %v1382_v17 = vmin.u32 %v1156_v26, %v1154_v16  ;;  %vm757_vm0 = vcmp.eq.s32.totalorder %v755_v15, 0  ;;  %vm760_vm1 = vcmp.eq.s32.totalorder %v755_v15, 2  ;;  %vm756_vm2 = vcmp.lt.s32.totalorder %v755_v15, 2 }
 0x135   :  { %v1531_v45 = vpop.eup %1530  ;;  %v622_v46 = vand.u32 3, %v621_v22  ;;  %vm897_vm3 = vcmp.eq.s32.totalorder %v895_v8, 0  ;;  %vm900_vm4 = vcmp.eq.s32.totalorder %v895_v8, 2  ;;  %v1037_v41 = vadd.s32 3, %v1033_v32 }
 0x136   :  { %v1158_v49 = vclz %v1382_v17  ;;  %v1533_v14 = vpop.eup %1532  ;;  %v761_v21 = vxor.u32 2147483648, %v1531_v45  ;;  %v1176_v7 = vsub.s32 4, %v2637_v12  ;;  %vm753_vm8 = vweird.f32 %v2232_v44 }
 0x137   :  { %v758_v28 = vxor.u32 2147483648, %v1533_v14  ;;  %vm624_vm5 = vcmp.eq.s32.totalorder %v622_v46, 0  ;;  %vm627_vm6 = vcmp.eq.s32.totalorder %v622_v46, 2  ;;  %vm623_vm7 = vcmp.lt.s32.totalorder %v622_v46, 2 }
 0x138   :  { %v1383_v30 = vadd.s32 4294967294, %v1158_v49  ;;  %v1535_v20 = vpop.eup %1534  ;;  %v762_v19 = vsel %vm760_vm1, %v761_v21, %v1533_v14  ;;  %vm896_vm9 = vcmp.lt.s32.totalorder %v895_v8, 2  ;;  %v1038_v53 = vand.u32 3, %v1037_v41 }
 0x139   :  { %v1537_v37 = vpop.eup %1536  ;;  %v759_v31 = vsel %vm757_vm0, %v1531_v45, %v758_v28  ;;  %v901_v38 = vxor.u32 2147483648, %v1535_v20  ;;  %vm2707_vm10 = vcmp.le.f32.partialorder %v1090_v27, 0.7853982  ;;  %vm1092_vm11 = vcmp.lt.s32.totalorder %v2554_v24, 0  ;;  %v74_v27 = vld [vmem:[%s2762_s3] sm:$0x1f] }
 0x13a   :  { %vm1384_vm15 = vcmp.lt.s32.totalorder %v1383_v30, 0  ;;  %v1539_v39 = vpop.eup %1538  ;;  %v898_v55 = vxor.u32 2147483648, %v1537_v37  ;;  %v763_v23 = vsel %vm756_vm2, %v759_v31, %v762_v19  ;;  %v1177_v17 = vsel %vm1092_vm11, %v1176_v7, %v2637_v12  ;;  %s1688_s3 = smov [#allocation12]  }
 0x13b   :  { %v1161_v51 = vsel %vm1384_vm15, 0, %v1383_v30  ;;  %v1541_v29 = vpop.eup %1540  ;;  %v628_v61 = vxor.u32 2147483648, %v1539_v39  ;;  %v902_v59 = vsel %vm900_vm4, %v901_v38, %v1537_v37  ;;  %vm1040_vm12 = vcmp.eq.s32.totalorder %v1038_v53, 0  ;;  %s1309_s1 = sshll.u32 %s1688_s3, 4  ;;  %s1310_s1 = int_to_ptr.vmem [resolvable:$true] %s1309_s1 }
 0x13c   :  { %v1162_v43 = vsub.s32 32, %v1161_v51  ;;  %v1163_v54 = vshll.u32 %v1154_v16, %v1161_v51  ;;  %v1166_v1 = vsub.s32 4294967266, %v1161_v51  ;;  %v625_v2 = vxor.u32 2147483648, %v1541_v29  ;;  %v1543_v5 = vpop.eup %1542  ;;  %s1617_s4 = scalar_lea.vmem %s1310_s1, 128  ;;  %p1622_p11 = scmp.lt.s32.totalorder %s1310_s1, %s1310_s1 }
 0x13d   :  { %v1545_v47 = vpop.eup %1544  ;;  %v629_v13 = vsel %vm627_vm6, %v628_v61, %v1541_v29  ;;  %v899_v26 = vsel %vm897_vm3, %v1535_v20, %v898_v55  ;;  %v1044_v11 = vxor.u32 2147483648, %v1543_v5  ;;  %vm1043_vm13 = vcmp.eq.s32.totalorder %v1038_v53, 2  ;;  %p1618_p10 = scmp.ne.s32.totalorder %s1310_s1, %s1617_s4  ;;  %p1623_p12 = scmp.lt.s32.totalorder %s1617_s4, %s1617_s4 }
 0x13e   :  { %v1164_v18 = vshrl.u32 %v1146_v33, %v1162_v43  ;;  %v1167_v40 = vadd.s32 127, %v1166_v1  ;;  %v626_v25 = vsel %vm624_vm5, %v1539_v39, %v625_v2  ;;  %v1041_v34 = vxor.u32 2147483648, %v1545_v47 }
 0x13f   :  { %vm620_vm14 = vweird.f32 %v2319_v63  ;;  %v764_v42 = vsel %vm753_vm8, nan, %v763_v23  ;;  %vm893_vm15 = vweird.f32 %v2185_v52  ;;  %v630_v49 = vsel %vm623_vm7, %v626_v25, %v629_v13  ;;  %p1624_p13 = por %p1623_p12, %p1622_p11 }
 0x140   :  { %v1165_v58 = vor.u32 %v1164_v18, %v1163_v54  ;;  %v1168_v36 = vshll.u32 %v1167_v40, 23  ;;  %v903_v12 = vsel %vm896_vm9, %v899_v26, %v902_v59  ;;  %v1179_v4 = vsel %vm2707_vm10, 0, %v1177_v17 }
 0x141   :  { %vm1039_vm0 = vcmp.lt.s32.totalorder %v1038_v53, 2  ;;  %v1042_v63 = vsel %vm1040_vm12, %v1543_v5, %v1041_v34  ;;  %v1045_v44 = vsel %vm1043_vm13, %v1044_v11, %v1545_v47  ;;  %v765_v50 = vmul.f32 %v764_v42, %v74_v27  ;;  %p1625_p0 = pnand %p1624_p13, %p1618_p10 }
 0x142   :  { %v1169_v0 = vor.u32 4788187, %v1168_v36  ;;  %v1172_v56 = vcvt.s32.f32 %v1165_v58  ;;  %v631_v52 = vsel %vm620_vm14, nan, %v630_v49  ;;  %v904_v30 = vsel %vm893_vm15, nan, %v903_v12 }
 0x143   :  { %v1183_v6 = vadd.s32 3, %v1179_v4  ;;  %vm1036_vm1 = vweird.f32 %v2466_v10  ;;  %v1046_v9 = vsel %vm1039_vm0, %v1042_v63, %v1045_v44  ;;  %v632_v45 = vmul.f32 %v631_v52, %v74_v27 }
 0x144   :  { %v1170_v48 = vand.u32 2147483647, %v1169_v0  ;;  %v767_v33 = vrot.slane %v765_v50, 1  ;;  %v905_v14 = vmul.f32 %v904_v30, %v74_v27  ;;  %v1047_v15 = vsel %vm1036_vm1, nan, %v1046_v9 }
 0x145   :  { %v1184_v60 = vand.u32 3, %v1183_v6  ;;  %v1048_v43 = vmul.f32 %v1047_v15, %v74_v27  ;;  %vm1182_vm5 = vweird.f32 %v2554_v24 }
 0x146   :  { %v1173_v16 = vmul.f32 %v1172_v56, %v1170_v48  ;;  %v769_v51 = vadd.f32 %v767_v33, %v632_v45  ;;  %v907_v22 = vrot.slane %v905_v14, 2 }
 0x147   :  { %vm1189_vm2 = vcmp.eq.s32.totalorder %v1184_v60, 2  ;;  %vm1186_vm3 = vcmp.eq.s32.totalorder %v1184_v60, 0  ;;  %vm1185_vm4 = vcmp.lt.s32.totalorder %v1184_v60, 2  ;;  %v1050_v37 = vrot.slane %v1048_v43, 3 }
 0x148   :  { %v1174_v35 = vxor.u32 2147483648, %v1173_v16  ;;  %v909_v8 = vadd.f32 %v907_v22, %v769_v51 }
 0x14a   :  { %v1175_v57 = vsel %vm1092_vm11, %v1174_v35, %v1173_v16  ;;  %v1052_v40 = vadd.f32 %v1050_v37, %v909_v8 }
 0x14b   :  { %v1178_v3 = vsel %vm2707_vm10, %v2554_v24, %v1175_v57 }
 0x14c   :  { %1546 = vcosq.f32 %v1178_v3 }
 0x14d   :  { %1548 = vsinq.f32 %v1178_v3 }
 0x156   :  { %v1547_v54 = vpop.eup %1546 }
 0x157   :  { %v1549_v1 = vpop.eup %1548  ;;  %v1190_v20 = vxor.u32 2147483648, %v1547_v54 }
 0x158   :  { %v1187_v21 = vxor.u32 2147483648, %v1549_v1 }
 0x159   :  { %v1191_v10 = vsel %vm1189_vm2, %v1190_v20, %v1549_v1 }
 0x15a   :  { %v1188_v28 = vsel %vm1186_vm3, %v1547_v54, %v1187_v21 }
 0x15b   :  { %v1192_v32 = vsel %vm1185_vm4, %v1188_v28, %v1191_v10 }
 0x15c   :  { %v1193_v18 = vsel %vm1182_vm5, nan, %v1192_v32 }
 0x15d   :  { %v1194_v39 = vmul.f32 %v1193_v18, %v74_v27 }
 0x15f   :  { %v1196_v29 = vrot.slane %v1194_v39, 4 }
 0x161   :  { %v1198_v46 = vadd.f32 %v1196_v29, %v1052_v40 }
 0x163   :  { %1435 = vmatmul.mubr.f32.vlgmr.msra.gmra.mrb[0].mxu0 %v1198_v46 }
 0x164   :  { %1628 = shalt.err (!%p1625_p0)
}
 0x165   :  { %s1629_s12 = scalar_lea.hbm %s2765_s6, 128 }
 0x166   :  { %p1630_p1 = scmp.ne.s32.totalorder %s2765_s6, %s1629_s12  ;;  %p1633_p2 = scmp.lt.u32.totalorder %s1629_s12, %s2765_s6 }
 0x168   :  { %p1635_p3 = pnand %p1633_p2, %p1630_p1 }
 0x16a   :  { %1638 = shalt.err (!%p1635_p3)
}
 0x16b   :  { %1312 = dma.vmem_to_hbm [thread:$0]  %s1310_s1, 128, %s2765_s6, [#allocation13]   ;;  %v1204_v24 = vld [vmem:[#allocation11] sm:$0x1] }
 0x16c   :  { %s1689_s18 = smov [#allocation11]  }
 0x16d   :  { %s1299_s19 = sshll.u32 %s1689_s18, 4  ;;  %s1300_s19 = int_to_ptr.vmem [resolvable:$true] %s1299_s19 }
 0x16e   :  { %s1639_s20 = scalar_lea.vmem %s1300_s19, 16  ;;  %s1643_s21 = scalar_lea.vmem %s1300_s19, 32 }
 0x16f   :  { %p1640_p4 = scmp.ne.s32.totalorder %s1300_s19, %s1639_s20  ;;  %p1644_p5 = scmp.lt.s32.totalorder %s1300_s19, %s1300_s19 }
 0x170   :  { %p1645_p6 = scmp.lt.s32.totalorder %s1643_s21, %s1639_s20 }
 0x172   :  { %p1646_p7 = por %p1645_p6, %p1644_p5 }
 0x174   :  { %p1647_p8 = pnand %p1646_p7, %p1640_p4 }
 0x236   :  { %v1287_v58 = vpop.f32.mrb[0].mxu0 }
 0x237   :  { %v1291_v36 = vadd.f32 %v1287_v58, %v1204_v24  ;;  %v1436_v41 = vpop.f32.mrb[1].mxu0 }
 0x239   :  { %1292 = vst [vmem:[#allocation11] sm:$0x1] %v1291_v36 }
 0x23a   :  { %1650 = shalt.err (!%p1647_p8)
}
 0x23b   :  { %s1651_s6 = scalar_lea.hbm %s2764_s5, 16 }
 0x23c   :  { %p1652_p9 = scmp.ne.s32.totalorder %s2764_s5, %s1651_s6  ;;  %p1655_p10 = scmp.lt.u32.totalorder %s1651_s6, %s2764_s5 }
 0x23e   :  { %p1657_p11 = pnand %p1655_p10, %p1652_p9 }
 0x240   :  { %1660 = shalt.err (!%p1657_p11)
}
 0x241   :  { %1302 = dma.vmem_to_hbm [thread:$0]  %s1300_s19, 16, %s2764_s5, [#allocation4]  }
 0x242   :  { %1669 = dma.done.wait [#allocation4], 16  }
 0x243   :  { %1670 = vsyncadd [#allocation4], 4294967280 }
 0x244   :  { %1671 = dma.done.wait [#allocation13], 128  }
 0x245   :  { %1672 = vsyncadd [#allocation13], 4294967168 }
 0x246   :  { %1319 = vsyncpa [#allocation3], 1 }
 0x247   :  { %1320 = vsyncpa [#allocation10], 1 }
 0x248   :  { %1321 = vsyncpa [#allocation4], 1 }
 0x249   :  { %1322 = vsyncpa [#allocation13], 1 }
 0x24a   :  { %1323 = vsyncpa [#allocation5], 1 }
 0x24b   :  { %1324 = vsyncpa [#allocation6], 1 }

</bundles_post_ra>
